<compile_context>
chip_gen: v7x
topology: tpu7x:2x2x1
jax: 0.10.0
libtpu: 0.0.40
codegen_flags: <defaults>
</compile_context>

<pallas_src>
import jax
import jax.numpy as jnp
from jax import lax
from jax.experimental import pallas as pl
from jax.experimental.pallas import tpu as pltpu


def _round_up(n, m):
    return ((n + m - 1) // m) * m


def _pick_chunk(T, target=64):
    """Largest divisor of T that is <= target (falls back to T)."""
    if T <= target:
        return T
    for ct in range(target, 7, -1):
        if T % ct == 0:
            return ct
    return T  # awkward T (e.g. large prime): single chunk


def gru_kernel(x_ref, h0_ref, wih_ref, whh_ref, bgi_ref, bhn_ref,
               wfc_ref, bfc_ref, out_ref, hn_ref, gi_scr):
    # x_ref:  (CT, Bb, I)    one time-chunk of inputs (f32, time-major)
    # h0_ref: (Bb, Hp)       initial hidden state (f32)
    # wih_ref:(I, 3*Hp)      fused gate columns [r | z | n] (matmul dtype)
    # whh_ref:(Hp, 3*Hp)     (matmul dtype)
    # bgi_ref:(1, 3*Hp)      b_ih (all gates) + b_hh (r,z gates), pre-folded (f32)
    # bhn_ref:(1, Hp)        b_hh of the n gate (stays inside r * (.)) (f32)
    # wfc_ref:(Hp, Op), bfc_ref:(1, Op)  classifier (padded logit cols bias -1e30)
    # out_ref:(Bb, Op)       log-probs, written on the last chunk only
    # hn_ref: (Bb, Hp)       final hidden; doubles as the cross-chunk carry
    # gi_scr: (CT, Bb, 3*Hp) per-chunk input projection (f32)
    CT, Bb, Ik = x_ref.shape
    Hp = h0_ref.shape[1]
    cdt = wih_ref.dtype                 # MXU operand dtype (bf16 or f32)
    c = pl.program_id(1)

    # ---- Chunk 0: seed the carried hidden state (resident across chunks).
    @pl.when(c == 0)
    def _():
        hn_ref[...] = h0_ref[...]

    # ---- Phase 1: project the whole chunk of inputs with ONE MXU matmul
    # (hoisted off the serial chain).  Bb is a multiple of 8, so the reshapes
    # are layout-preserving (full sublane tiles).
    x2d = x_ref[...].reshape(CT * Bb, Ik).astype(cdt)
    gi = (jnp.dot(x2d, wih_ref[...], preferred_element_type=jnp.float32)
          + bgi_ref[...])
    gi_scr[...] = gi.reshape(CT, Bb, 3 * Hp)

    # ---- Phase 2: the truly sequential recurrence — one (Bb,Hp)x(Hp,3Hp)
    # matmul + elementwise per step.  Capped unroll avoids vreg spills.
    whh = whh_ref[...]
    bhn = bhn_ref[...]

    def step(t, h):
        gi_t = gi_scr[t]                                          # (Bb, 3Hp)
        gh = jnp.dot(h.astype(cdt), whh,
                     preferred_element_type=jnp.float32)          # (Bb, 3Hp)
        # sigmoid(a) = 0.5*(1 + tanh(a/2)) -> one EUP pass per gate.
        rz = 0.5 * (jnp.tanh(0.5 * (gi_t[:, :2 * Hp] + gh[:, :2 * Hp])) + 1.0)
        r = rz[:, :Hp]
        z = rz[:, Hp:]
        n = jnp.tanh(gi_t[:, 2 * Hp:] + r * (gh[:, 2 * Hp:] + bhn))
        return n + z * (h - n)                                    # == (1-z)*n + z*h

    h = lax.fori_loop(0, CT, step, hn_ref[...], unroll=min(CT, 8))
    hn_ref[...] = h

    # ---- Phase 3 (last chunk only): classifier head + LogSoftmax (f32).
    @pl.when(c == pl.num_programs(1) - 1)
    def _():
        logits = (jnp.dot(h, wfc_ref[...], preferred_element_type=jnp.float32)
                  + bfc_ref[...])
        m = jnp.max(logits, axis=-1, keepdims=True)
        lse = jnp.log(jnp.sum(jnp.exp(logits - m), axis=-1, keepdims=True)) + m
        out_ref[...] = logits - lse


def gru_forward(x, h0, params, *, matmul_dtype=jnp.bfloat16, chunk_target=64):
    """x: (B, T, I) f32, h0: (1, B, H) f32 -> (log_probs (B, O), hn (1, B, H))."""
    w_ih, w_hh, b_ih, b_hh, w_fc, b_fc = params   # (3,I,H),(3,H,H),(3,1,H),(3,1,H),(H,O),(1,O)
    B, T, I = x.shape
    H = w_hh.shape[2]
    O = w_fc.shape[1]
    f32 = jnp.float32

    Bp = _round_up(B, 8)            # full sublanes
    Hp = _round_up(H, 128)          # lane-dense hidden / per-gate width
    Op = _round_up(O, 128)          # lane-dense logits

    # Batch blocks: 2 blocks -> both TensorCores on v7x (no-op on v5e/v6e).
    n_bblk = 2 if (B >= 16 and Bp % 16 == 0) else 1
    Bb = Bp // n_bblk
    CT = _pick_chunk(T, chunk_target)      # timesteps per grid chunk
    n_chunks = T // CT

    # Time-major x, batch padded to a full sublane.  The feature (lane) dim is
    # NOT padded -- lane-padding the streamed tensor would multiply HBM traffic.
    x_tm = jnp.transpose(x, (1, 0, 2))                               # (T, B, I)
    x_p = jnp.zeros((T, Bp, I), f32).at[:, :B, :].set(x_tm)
    h0_p = jnp.zeros((Bp, Hp), f32).at[:B, :H].set(h0[0])

    # Fused gate weights, gate columns 128-aligned: [r | z | n].
    w_ih_p = jnp.zeros((I, 3 * Hp), f32)
    w_hh_p = jnp.zeros((Hp, 3 * Hp), f32)
    for g in range(3):
        w_ih_p = w_ih_p.at[:, g * Hp:g * Hp + H].set(w_ih[g])
        w_hh_p = w_hh_p.at[:H, g * Hp:g * Hp + H].set(w_hh[g])
    w_ih_p = w_ih_p.astype(matmul_dtype)
    w_hh_p = w_hh_p.astype(matmul_dtype)

    # Pre-fold biases: b_ih (all gates) + b_hh (r,z); b_hh_n stays inside r*(.).
    b_gi_p = jnp.zeros((1, 3 * Hp), f32)
    b_gi_p = b_gi_p.at[0, 0 * Hp:0 * Hp + H].set(b_ih[0, 0] + b_hh[0, 0])
    b_gi_p = b_gi_p.at[0, 1 * Hp:1 * Hp + H].set(b_ih[1, 0] + b_hh[1, 0])
    b_gi_p = b_gi_p.at[0, 2 * Hp:2 * Hp + H].set(b_ih[2, 0])
    b_hn_p = jnp.zeros((1, Hp), f32).at[0, :H].set(b_hh[2, 0])

    w_fc_p = jnp.zeros((Hp, Op), f32).at[:H, :O].set(w_fc)
    # Padded logit columns get a huge negative bias so LogSoftmax ignores them.
    b_fc_p = jnp.full((1, Op), -1e30, f32).at[0, :O].set(b_fc[0])

    # VMEM budget from the actual (double-buffered) blocks + scratch, clamped
    # to the v7x physical 64 MiB.
    itm = jnp.dtype(matmul_dtype).itemsize
    block_bytes = (CT * Bb * I * 4 + Bb * Hp * 4
                   + I * 3 * Hp * itm + Hp * 3 * Hp * itm
                   + 3 * Hp * 4 + Hp * 4 + Hp * Op * 4 + Op * 4
                   + Bb * Op * 4 + Bb * Hp * 4)
    gi_bytes = CT * max(Bb, 8) * 3 * Hp * 4
    vmem_limit = int(min(max(2 * block_bytes + gi_bytes + (4 << 20), 8 << 20),
                         64 << 20))

    flops = (2 * T * Bp * I * 3 * Hp          # batched input projection
             + 2 * T * Bp * Hp * 3 * Hp       # recurrent matmuls
             + 2 * Bp * Hp * Op)              # classifier
    transcendentals = 3 * T * Bp * Hp + Bp * Op
    bytes_accessed = int(x_p.size * 4
                         + (h0_p.size + b_gi_p.size + b_hn_p.size
                            + w_fc_p.size + b_fc_p.size) * 4
                         + (w_ih_p.size + w_hh_p.size) * itm
                         + (Bp * Op + Bp * Hp) * 4)

    out_p, hn_p = pl.pallas_call(
        gru_kernel,
        out_shape=(jax.ShapeDtypeStruct((Bp, Op), f32),
                   jax.ShapeDtypeStruct((Bp, Hp), f32)),
        grid_spec=pltpu.PrefetchScalarGridSpec(
            num_scalar_prefetch=0,
            grid=(n_bblk, n_chunks),
            in_specs=[
                pl.BlockSpec((CT, Bb, I), lambda bb, c: (c, bb, 0)),     # x chunk
                pl.BlockSpec((Bb, Hp), lambda bb, c: (bb, 0)),           # h0
                pl.BlockSpec((I, 3 * Hp), lambda bb, c: (0, 0)),         # W_ih
                pl.BlockSpec((Hp, 3 * Hp), lambda bb, c: (0, 0)),        # W_hh
                pl.BlockSpec((1, 3 * Hp), lambda bb, c: (0, 0)),         # b_gi
                pl.BlockSpec((1, Hp), lambda bb, c: (0, 0)),             # b_hn
                pl.BlockSpec((Hp, Op), lambda bb, c: (0, 0)),            # W_fc
                pl.BlockSpec((1, Op), lambda bb, c: (0, 0)),             # b_fc
            ],
            out_specs=[
                pl.BlockSpec((Bb, Op), lambda bb, c: (bb, 0)),           # log-probs
                pl.BlockSpec((Bb, Hp), lambda bb, c: (bb, 0)),           # h_n / carry
            ],
            scratch_shapes=[pltpu.VMEM((CT, Bb, 3 * Hp), f32)],
        ),
        compiler_params=pltpu.CompilerParams(
            dimension_semantics=("parallel", "arbitrary"),
            vmem_limit_bytes=vmem_limit),
        cost_estimate=pl.CostEstimate(flops=flops,
                                      transcendentals=transcendentals,
                                      bytes_accessed=bytes_accessed),
    )(x_p, h0_p, w_ih_p, w_hh_p, b_gi_p, b_hn_p, w_fc_p, b_fc_p)

    return out_p[:B, :O], hn_p[None, :B, :H]


def gru_reference(x, h0, params):
    """Pure-JAX reference replicating torch GRU + Linear + LogSoftmax."""
    w_ih, w_hh, b_ih, b_hh, w_fc, b_fc = params
    xs = jnp.transpose(x, (1, 0, 2))      # (T, B, I)
    h = h0[0]
    for t in range(xs.shape[0]):
        x_t = xs[t]
        gi_r = x_t @ w_ih[0] + b_ih[0]
        gi_z = x_t @ w_ih[1] + b_ih[1]
        gi_n = x_t @ w_ih[2] + b_ih[2]
        gh_r = h @ w_hh[0] + b_hh[0]
        gh_z = h @ w_hh[1] + b_hh[1]
        gh_n = h @ w_hh[2] + b_hh[2]
        r = jax.nn.sigmoid(gi_r + gh_r)
        z = jax.nn.sigmoid(gi_z + gh_z)
        n = jnp.tanh(gi_n + r * gh_n)
        h = (1.0 - z) * n + z * h
    logits = h @ w_fc + b_fc
    out = jax.nn.log_softmax(logits, axis=-1)
    return out, h[None]


def init_params(key, input_size, hidden_size, output_size):
    """Deterministic param init, shapes matching nn.GRU/nn.Linear (pre-transposed)."""
    k = 1.0 / jnp.sqrt(hidden_size)
    kf = 1.0 / jnp.sqrt(hidden_size)
    keys = jax.random.split(key, 6)
    # nn.GRU: weight_ih_l0 (3H, I), weight_hh_l0 (3H, H); stored as (3, I, H)/(3, H, H)
    w_ih = jax.random.uniform(keys[0], (3, input_size, hidden_size), jnp.float32, -k, k)
    w_hh = jax.random.uniform(keys[1], (3, hidden_size, hidden_size), jnp.float32, -k, k)
    b_ih = jax.random.uniform(keys[2], (3, 1, hidden_size), jnp.float32, -k, k)
    b_hh = jax.random.uniform(keys[3], (3, 1, hidden_size), jnp.float32, -k, k)
    # nn.Linear(hidden, output): weight (O, H) -> stored transposed (H, O)
    w_fc = jax.random.uniform(keys[4], (hidden_size, output_size), jnp.float32, -kf, kf)
    b_fc = jax.random.uniform(keys[5], (1, output_size), jnp.float32, -kf, kf)
    return (w_ih, w_hh, b_ih, b_hh, w_fc, b_fc)


if __name__ == "__main__":
    B, T, I, H, O = 2, 8, 16, 32, 8   # batch, seq, input_size, hidden_size, output_size
    key = jax.random.PRNGKey(0)
    k_x, k_p = jax.random.split(key)

    x = jax.random.normal(k_x, (B, T, I), jnp.float32)
    h0 = jnp.zeros((1, B, H), jnp.float32)          # initHidden()
    params = init_params(k_p, I, H, O)

    out_gold, hn_gold = gru_reference(x, h0, params)

    # f32 MXU operands: tight check against the pure-JAX reference.
    out32, hn32 = gru_forward(x, h0, params, matmul_dtype=jnp.float32)
    jax.block_until_ready((out32, hn32))
    assert jnp.allclose(out32, out_gold, atol=1e-5, rtol=1e-5), "f32 output mismatch"
    assert jnp.allclose(hn32, hn_gold, atol=1e-5, rtol=1e-5), "f32 hidden mismatch"

    # bf16 MXU operands (default fast path on v6e/v7x): looser tolerance
    # through the recurrence, elementwise math still f32.
    outbf, hnbf = gru_forward(x, h0, params)
    jax.block_until_ready((outbf, hnbf))
    assert jnp.allclose(outbf, out_gold, atol=5e-2, rtol=5e-2), "bf16 output mismatch"
    assert jnp.allclose(hnbf, hn_gold, atol=5e-2, rtol=5e-2), "bf16 hidden mismatch"

    print("KERNEL_OK")
</pallas_src>

<mosaic_0001>
module attributes {stable_mosaic.version = 11 : i64} {
  func.func @gru_kernel(%arg0: i32, %arg1: i32, %arg2: memref<8x8x16xf32, #tpu.memory_space<vmem>>, %arg3: memref<8x128xf32, #tpu.memory_space<vmem>>, %arg4: memref<16x384xf32, #tpu.memory_space<vmem>>, %arg5: memref<128x384xf32, #tpu.memory_space<vmem>>, %arg6: memref<1x384xf32, #tpu.memory_space<vmem>>, %arg7: memref<1x128xf32, #tpu.memory_space<vmem>>, %arg8: memref<128x128xf32, #tpu.memory_space<vmem>>, %arg9: memref<1x128xf32, #tpu.memory_space<vmem>>, %arg10: memref<8x128xf32, #tpu.memory_space<vmem>>, %arg11: memref<8x128xf32, #tpu.memory_space<vmem>>, %arg12: memref<8x8x384xf32, #tpu.memory_space<vmem>>) attributes {dimension_semantics = [#tpu.dimension_semantics<parallel>, #tpu.dimension_semantics<arbitrary>], iteration_bounds = array<i64: 1, 1>, scalar_prefetch = 0 : i64, scratch_operands = 1 : i64, tpu.core_type = #tpu.core_type<tc>, window_params = [{transform_indices = @transform_0, window_bounds = array<i64: 8, 8, 16>}, {transform_indices = @transform_1, window_bounds = array<i64: 8, 128>}, {pipeline_mode = #tpu.pipeline_mode<synchronous>, transform_indices = @transform_2, window_bounds = array<i64: 16, 384>}, {pipeline_mode = #tpu.pipeline_mode<synchronous>, transform_indices = @transform_3, window_bounds = array<i64: 128, 384>}, {pipeline_mode = #tpu.pipeline_mode<synchronous>, transform_indices = @transform_4, window_bounds = array<i64: 1, 384>}, {pipeline_mode = #tpu.pipeline_mode<synchronous>, transform_indices = @transform_5, window_bounds = array<i64: 1, 128>}, {pipeline_mode = #tpu.pipeline_mode<synchronous>, transform_indices = @transform_6, window_bounds = array<i64: 128, 128>}, {pipeline_mode = #tpu.pipeline_mode<synchronous>, transform_indices = @transform_7, window_bounds = array<i64: 1, 128>}, {transform_indices = @transform_8, window_bounds = array<i64: 8, 128>}, {transform_indices = @transform_9, window_bounds = array<i64: 8, 128>}]} {
    %c0_i32 = arith.constant 0 : i32
    %0 = arith.cmpi eq, %arg1, %c0_i32 : i32
    %1 = arith.extui %0 : i1 to i32
    %c0_i32_0 = arith.constant 0 : i32
    %2 = arith.cmpi ne, %1, %c0_i32_0 : i32
    scf.if %2 {
      %c0_69 = arith.constant 0 : index
      %c0_70 = arith.constant 0 : index
      %227 = vector.load %arg3[%c0_69, %c0_70] : memref<8x128xf32, #tpu.memory_space<vmem>>, vector<8x128xf32>
      %c0_71 = arith.constant 0 : index
      %c0_72 = arith.constant 0 : index
      %228 = vector.load %arg11[%c0_71, %c0_72] : memref<8x128xf32, #tpu.memory_space<vmem>>, vector<8x128xf32>
      tpu.vector_store %arg11[%c0_71, %c0_72], %227 {strides = array<i32>} : memref<8x128xf32, #tpu.memory_space<vmem>>, vector<8x128xf32>,
    } else {
    }
    %c0 = arith.constant 0 : index
    %c0_1 = arith.constant 0 : index
    %c0_2 = arith.constant 0 : index
    %3 = vector.load %arg2[%c0, %c0_1, %c0_2] : memref<8x8x16xf32, #tpu.memory_space<vmem>>, vector<8x8x16xf32>
    %4 = vector.shape_cast %3 : vector<8x8x16xf32> to vector<64x16xf32>
    %c0_3 = arith.constant 0 : index
    %c0_4 = arith.constant 0 : index
    %5 = vector.load %arg4[%c0_3, %c0_4] : memref<16x384xf32, #tpu.memory_space<vmem>>, vector<16x384xf32>
    %cst = arith.constant dense<0.000000e+00> : vector<64x384xf32>
    %6 = tpu.matmul %4, %5, %cst {dimension_numbers = #tpu.dot_dimension_numbers<[1], [0], [0], [1], [0, 0, 1, 1], [], []>} : vector<64x16xf32>, vector<16x384xf32>, vector<64x384xf32> -> vector<64x384xf32>
    %c0_5 = arith.constant 0 : index
    %c0_6 = arith.constant 0 : index
    %7 = vector.load %arg6[%c0_5, %c0_6] : memref<1x384xf32, #tpu.memory_space<vmem>>, vector<1x384xf32>
    %8 = vector.broadcast %7 : vector<1x384xf32> to vector<64x384xf32>
    %9 = arith.addf %6, %8 : vector<64x384xf32>
    %10 = vector.shape_cast %9 : vector<64x384xf32> to vector<8x8x384xf32>
    %c0_7 = arith.constant 0 : index
    %c0_8 = arith.constant 0 : index
    %c0_9 = arith.constant 0 : index
    %11 = vector.load %arg12[%c0_7, %c0_8, %c0_9] : memref<8x8x384xf32, #tpu.memory_space<vmem>>, vector<8x8x384xf32>
    tpu.vector_store %arg12[%c0_7, %c0_8, %c0_9], %10 {strides = array<i32>} : memref<8x8x384xf32, #tpu.memory_space<vmem>>, vector<8x8x384xf32>,
    %c0_10 = arith.constant 0 : index
    %c0_11 = arith.constant 0 : index
    %12 = vector.load %arg5[%c0_10, %c0_11] : memref<128x384xf32, #tpu.memory_space<vmem>>, vector<128x384xf32>
    %c0_12 = arith.constant 0 : index
    %c0_13 = arith.constant 0 : index
    %13 = vector.load %arg7[%c0_12, %c0_13] : memref<1x128xf32, #tpu.memory_space<vmem>>, vector<1x128xf32>
    %c0_14 = arith.constant 0 : index
    %c0_15 = arith.constant 0 : index
    %14 = vector.load %arg11[%c0_14, %c0_15] : memref<8x128xf32, #tpu.memory_space<vmem>>, vector<8x128xf32>
    %c0_i32_16 = arith.constant 0 : i32
    %15 = arith.index_cast %c0_i32_16 : i32 to index
    %c0_17 = arith.constant 0 : index
    %c0_18 = arith.constant 0 : index
    %16 = vector.load %arg12[%15, %c0_17, %c0_18] : memref<8x8x384xf32, #tpu.memory_space<vmem>>, vector<1x8x384xf32>
    %17 = vector.shape_cast %16 : vector<1x8x384xf32> to vector<8x384xf32>
    %cst_19 = arith.constant dense<0.000000e+00> : vector<8x384xf32>
    %18 = tpu.matmul %14, %12, %cst_19 {dimension_numbers = #tpu.dot_dimension_numbers<[1], [0], [0], [1], [0, 0, 1, 1], [], []>} : vector<8x128xf32>, vector<128x384xf32>, vector<8x384xf32> -> vector<8x384xf32>
    %19 = vector.extract_strided_slice %17 {offsets = [0, 0], sizes = [8, 256], strides = [1, 1]} : vector<8x384xf32> to vector<8x256xf32>
    %20 = vector.extract_strided_slice %18 {offsets = [0, 0], sizes = [8, 256], strides = [1, 1]} : vector<8x384xf32> to vector<8x256xf32>
    %21 = arith.addf %19, %20 : vector<8x256xf32>
    %cst_20 = arith.constant 5.000000e-01 : f32
    %22 = vector.broadcast %cst_20 : f32 to vector<8x256xf32>
    %23 = arith.mulf %22, %21 : vector<8x256xf32>
    %24 = math.tanh %23 : vector<8x256xf32>
    %cst_21 = arith.constant 1.000000e+00 : f32
    %25 = vector.broadcast %cst_21 : f32 to vector<8x256xf32>
    %26 = arith.addf %24, %25 : vector<8x256xf32>
    %cst_22 = arith.constant 5.000000e-01 : f32
    %27 = vector.broadcast %cst_22 : f32 to vector<8x256xf32>
    %28 = arith.mulf %27, %26 : vector<8x256xf32>
    %29 = vector.extract_strided_slice %28 {offsets = [0, 0], sizes = [8, 128], strides = [1, 1]} : vector<8x256xf32> to vector<8x128xf32>
    %30 = vector.extract_strided_slice %28 {offsets = [0, 128], sizes = [8, 128], strides = [1, 1]} : vector<8x256xf32> to vector<8x128xf32>
    %31 = vector.extract_strided_slice %17 {offsets = [0, 256], sizes = [8, 128], strides = [1, 1]} : vector<8x384xf32> to vector<8x128xf32>
    %32 = vector.extract_strided_slice %18 {offsets = [0, 256], sizes = [8, 128], strides = [1, 1]} : vector<8x384xf32> to vector<8x128xf32>
    %33 = vector.broadcast %13 : vector<1x128xf32> to vector<8x128xf32>
    %34 = arith.addf %32, %33 : vector<8x128xf32>
    %35 = arith.mulf %29, %34 : vector<8x128xf32>
    %36 = arith.addf %31, %35 : vector<8x128xf32>
    %37 = math.tanh %36 : vector<8x128xf32>
    %38 = arith.subf %14, %37 : vector<8x128xf32>
    %39 = arith.mulf %30, %38 : vector<8x128xf32>
    %40 = arith.addf %37, %39 : vector<8x128xf32>
    %c1_i32 = arith.constant 1 : i32
    %41 = arith.index_cast %c1_i32 : i32 to index
    %c0_23 = arith.constant 0 : index
    %c0_24 = arith.constant 0 : index
    %42 = vector.load %arg12[%41, %c0_23, %c0_24] : memref<8x8x384xf32, #tpu.memory_space<vmem>>, vector<1x8x384xf32>
    %43 = vector.shape_cast %42 : vector<1x8x384xf32> to vector<8x384xf32>
    %cst_25 = arith.constant dense<0.000000e+00> : vector<8x384xf32>
    %44 = tpu.matmul %40, %12, %cst_25 {dimension_numbers = #tpu.dot_dimension_numbers<[1], [0], [0], [1], [0, 0, 1, 1], [], []>} : vector<8x128xf32>, vector<128x384xf32>, vector<8x384xf32> -> vector<8x384xf32>
    %45 = vector.extract_strided_slice %43 {offsets = [0, 0], sizes = [8, 256], strides = [1, 1]} : vector<8x384xf32> to vector<8x256xf32>
    %46 = vector.extract_strided_slice %44 {offsets = [0, 0], sizes = [8, 256], strides = [1, 1]} : vector<8x384xf32> to vector<8x256xf32>
    %47 = arith.addf %45, %46 : vector<8x256xf32>
    %cst_26 = arith.constant 5.000000e-01 : f32
    %48 = vector.broadcast %cst_26 : f32 to vector<8x256xf32>
    %49 = arith.mulf %48, %47 : vector<8x256xf32>
    %50 = math.tanh %49 : vector<8x256xf32>
    %cst_27 = arith.constant 1.000000e+00 : f32
    %51 = vector.broadcast %cst_27 : f32 to vector<8x256xf32>
    %52 = arith.addf %50, %51 : vector<8x256xf32>
    %cst_28 = arith.constant 5.000000e-01 : f32
    %53 = vector.broadcast %cst_28 : f32 to vector<8x256xf32>
    %54 = arith.mulf %53, %52 : vector<8x256xf32>
    %55 = vector.extract_strided_slice %54 {offsets = [0, 0], sizes = [8, 128], strides = [1, 1]} : vector<8x256xf32> to vector<8x128xf32>
    %56 = vector.extract_strided_slice %54 {offsets = [0, 128], sizes = [8, 128], strides = [1, 1]} : vector<8x256xf32> to vector<8x128xf32>
    %57 = vector.extract_strided_slice %43 {offsets = [0, 256], sizes = [8, 128], strides = [1, 1]} : vector<8x384xf32> to vector<8x128xf32>
    %58 = vector.extract_strided_slice %44 {offsets = [0, 256], sizes = [8, 128], strides = [1, 1]} : vector<8x384xf32> to vector<8x128xf32>
    %59 = vector.broadcast %13 : vector<1x128xf32> to vector<8x128xf32>
    %60 = arith.addf %58, %59 : vector<8x128xf32>
    %61 = arith.mulf %55, %60 : vector<8x128xf32>
    %62 = arith.addf %57, %61 : vector<8x128xf32>
    %63 = math.tanh %62 : vector<8x128xf32>
    %64 = arith.subf %40, %63 : vector<8x128xf32>
    %65 = arith.mulf %56, %64 : vector<8x128xf32>
    %66 = arith.addf %63, %65 : vector<8x128xf32>
    %c2_i32 = arith.constant 2 : i32
    %67 = arith.index_cast %c2_i32 : i32 to index
    %c0_29 = arith.constant 0 : index
    %c0_30 = arith.constant 0 : index
    %68 = vector.load %arg12[%67, %c0_29, %c0_30] : memref<8x8x384xf32, #tpu.memory_space<vmem>>, vector<1x8x384xf32>
    %69 = vector.shape_cast %68 : vector<1x8x384xf32> to vector<8x384xf32>
    %cst_31 = arith.constant dense<0.000000e+00> : vector<8x384xf32>
    %70 = tpu.matmul %66, %12, %cst_31 {dimension_numbers = #tpu.dot_dimension_numbers<[1], [0], [0], [1], [0, 0, 1, 1], [], []>} : vector<8x128xf32>, vector<128x384xf32>, vector<8x384xf32> -> vector<8x384xf32>
    %71 = vector.extract_strided_slice %69 {offsets = [0, 0], sizes = [8, 256], strides = [1, 1]} : vector<8x384xf32> to vector<8x256xf32>
    %72 = vector.extract_strided_slice %70 {offsets = [0, 0], sizes = [8, 256], strides = [1, 1]} : vector<8x384xf32> to vector<8x256xf32>
    %73 = arith.addf %71, %72 : vector<8x256xf32>
    %cst_32 = arith.constant 5.000000e-01 : f32
    %74 = vector.broadcast %cst_32 : f32 to vector<8x256xf32>
    %75 = arith.mulf %74, %73 : vector<8x256xf32>
    %76 = math.tanh %75 : vector<8x256xf32>
    %cst_33 = arith.constant 1.000000e+00 : f32
    %77 = vector.broadcast %cst_33 : f32 to vector<8x256xf32>
    %78 = arith.addf %76, %77 : vector<8x256xf32>
    %cst_34 = arith.constant 5.000000e-01 : f32
    %79 = vector.broadcast %cst_34 : f32 to vector<8x256xf32>
    %80 = arith.mulf %79, %78 : vector<8x256xf32>
    %81 = vector.extract_strided_slice %80 {offsets = [0, 0], sizes = [8, 128], strides = [1, 1]} : vector<8x256xf32> to vector<8x128xf32>
    %82 = vector.extract_strided_slice %80 {offsets = [0, 128], sizes = [8, 128], strides = [1, 1]} : vector<8x256xf32> to vector<8x128xf32>
    %83 = vector.extract_strided_slice %69 {offsets = [0, 256], sizes = [8, 128], strides = [1, 1]} : vector<8x384xf32> to vector<8x128xf32>
    %84 = vector.extract_strided_slice %70 {offsets = [0, 256], sizes = [8, 128], strides = [1, 1]} : vector<8x384xf32> to vector<8x128xf32>
    %85 = vector.broadcast %13 : vector<1x128xf32> to vector<8x128xf32>
    %86 = arith.addf %84, %85 : vector<8x128xf32>
    %87 = arith.mulf %81, %86 : vector<8x128xf32>
    %88 = arith.addf %83, %87 : vector<8x128xf32>
    %89 = math.tanh %88 : vector<8x128xf32>
    %90 = arith.subf %66, %89 : vector<8x128xf32>
    %91 = arith.mulf %82, %90 : vector<8x128xf32>
    %92 = arith.addf %89, %91 : vector<8x128xf32>
    %c3_i32 = arith.constant 3 : i32
    %93 = arith.index_cast %c3_i32 : i32 to index
    %c0_35 = arith.constant 0 : index
    %c0_36 = arith.constant 0 : index
    %94 = vector.load %arg12[%93, %c0_35, %c0_36] : memref<8x8x384xf32, #tpu.memory_space<vmem>>, vector<1x8x384xf32>
    %95 = vector.shape_cast %94 : vector<1x8x384xf32> to vector<8x384xf32>
    %cst_37 = arith.constant dense<0.000000e+00> : vector<8x384xf32>
    %96 = tpu.matmul %92, %12, %cst_37 {dimension_numbers = #tpu.dot_dimension_numbers<[1], [0], [0], [1], [0, 0, 1, 1], [], []>} : vector<8x128xf32>, vector<128x384xf32>, vector<8x384xf32> -> vector<8x384xf32>
    %97 = vector.extract_strided_slice %95 {offsets = [0, 0], sizes = [8, 256], strides = [1, 1]} : vector<8x384xf32> to vector<8x256xf32>
    %98 = vector.extract_strided_slice %96 {offsets = [0, 0], sizes = [8, 256], strides = [1, 1]} : vector<8x384xf32> to vector<8x256xf32>
    %99 = arith.addf %97, %98 : vector<8x256xf32>
    %cst_38 = arith.constant 5.000000e-01 : f32
    %100 = vector.broadcast %cst_38 : f32 to vector<8x256xf32>
    %101 = arith.mulf %100, %99 : vector<8x256xf32>
    %102 = math.tanh %101 : vector<8x256xf32>
    %cst_39 = arith.constant 1.000000e+00 : f32
    %103 = vector.broadcast %cst_39 : f32 to vector<8x256xf32>
    %104 = arith.addf %102, %103 : vector<8x256xf32>
    %cst_40 = arith.constant 5.000000e-01 : f32
    %105 = vector.broadcast %cst_40 : f32 to vector<8x256xf32>
    %106 = arith.mulf %105, %104 : vector<8x256xf32>
    %107 = vector.extract_strided_slice %106 {offsets = [0, 0], sizes = [8, 128], strides = [1, 1]} : vector<8x256xf32> to vector<8x128xf32>
    %108 = vector.extract_strided_slice %106 {offsets = [0, 128], sizes = [8, 128], strides = [1, 1]} : vector<8x256xf32> to vector<8x128xf32>
    %109 = vector.extract_strided_slice %95 {offsets = [0, 256], sizes = [8, 128], strides = [1, 1]} : vector<8x384xf32> to vector<8x128xf32>
    %110 = vector.extract_strided_slice %96 {offsets = [0, 256], sizes = [8, 128], strides = [1, 1]} : vector<8x384xf32> to vector<8x128xf32>
    %111 = vector.broadcast %13 : vector<1x128xf32> to vector<8x128xf32>
    %112 = arith.addf %110, %111 : vector<8x128xf32>
    %113 = arith.mulf %107, %112 : vector<8x128xf32>
    %114 = arith.addf %109, %113 : vector<8x128xf32>
    %115 = math.tanh %114 : vector<8x128xf32>
    %116 = arith.subf %92, %115 : vector<8x128xf32>
    %117 = arith.mulf %108, %116 : vector<8x128xf32>
    %118 = arith.addf %115, %117 : vector<8x128xf32>
    %c4_i32 = arith.constant 4 : i32
    %119 = arith.index_cast %c4_i32 : i32 to index
    %c0_41 = arith.constant 0 : index
    %c0_42 = arith.constant 0 : index
    %120 = vector.load %arg12[%119, %c0_41, %c0_42] : memref<8x8x384xf32, #tpu.memory_space<vmem>>, vector<1x8x384xf32>
    %121 = vector.shape_cast %120 : vector<1x8x384xf32> to vector<8x384xf32>
    %cst_43 = arith.constant dense<0.000000e+00> : vector<8x384xf32>
    %122 = tpu.matmul %118, %12, %cst_43 {dimension_numbers = #tpu.dot_dimension_numbers<[1], [0], [0], [1], [0, 0, 1, 1], [], []>} : vector<8x128xf32>, vector<128x384xf32>, vector<8x384xf32> -> vector<8x384xf32>
    %123 = vector.extract_strided_slice %121 {offsets = [0, 0], sizes = [8, 256], strides = [1, 1]} : vector<8x384xf32> to vector<8x256xf32>
    %124 = vector.extract_strided_slice %122 {offsets = [0, 0], sizes = [8, 256], strides = [1, 1]} : vector<8x384xf32> to vector<8x256xf32>
    %125 = arith.addf %123, %124 : vector<8x256xf32>
    %cst_44 = arith.constant 5.000000e-01 : f32
    %126 = vector.broadcast %cst_44 : f32 to vector<8x256xf32>
    %127 = arith.mulf %126, %125 : vector<8x256xf32>
    %128 = math.tanh %127 : vector<8x256xf32>
    %cst_45 = arith.constant 1.000000e+00 : f32
    %129 = vector.broadcast %cst_45 : f32 to vector<8x256xf32>
    %130 = arith.addf %128, %129 : vector<8x256xf32>
    %cst_46 = arith.constant 5.000000e-01 : f32
    %131 = vector.broadcast %cst_46 : f32 to vector<8x256xf32>
    %132 = arith.mulf %131, %130 : vector<8x256xf32>
    %133 = vector.extract_strided_slice %132 {offsets = [0, 0], sizes = [8, 128], strides = [1, 1]} : vector<8x256xf32> to vector<8x128xf32>
    %134 = vector.extract_strided_slice %132 {offsets = [0, 128], sizes = [8, 128], strides = [1, 1]} : vector<8x256xf32> to vector<8x128xf32>
    %135 = vector.extract_strided_slice %121 {offsets = [0, 256], sizes = [8, 128], strides = [1, 1]} : vector<8x384xf32> to vector<8x128xf32>
    %136 = vector.extract_strided_slice %122 {offsets = [0, 256], sizes = [8, 128], strides = [1, 1]} : vector<8x384xf32> to vector<8x128xf32>
    %137 = vector.broadcast %13 : vector<1x128xf32> to vector<8x128xf32>
    %138 = arith.addf %136, %137 : vector<8x128xf32>
    %139 = arith.mulf %133, %138 : vector<8x128xf32>
    %140 = arith.addf %135, %139 : vector<8x128xf32>
    %141 = math.tanh %140 : vector<8x128xf32>
    %142 = arith.subf %118, %141 : vector<8x128xf32>
    %143 = arith.mulf %134, %142 : vector<8x128xf32>
    %144 = arith.addf %141, %143 : vector<8x128xf32>
    %c5_i32 = arith.constant 5 : i32
    %145 = arith.index_cast %c5_i32 : i32 to index
    %c0_47 = arith.constant 0 : index
    %c0_48 = arith.constant 0 : index
    %146 = vector.load %arg12[%145, %c0_47, %c0_48] : memref<8x8x384xf32, #tpu.memory_space<vmem>>, vector<1x8x384xf32>
    %147 = vector.shape_cast %146 : vector<1x8x384xf32> to vector<8x384xf32>
    %cst_49 = arith.constant dense<0.000000e+00> : vector<8x384xf32>
    %148 = tpu.matmul %144, %12, %cst_49 {dimension_numbers = #tpu.dot_dimension_numbers<[1], [0], [0], [1], [0, 0, 1, 1], [], []>} : vector<8x128xf32>, vector<128x384xf32>, vector<8x384xf32> -> vector<8x384xf32>
    %149 = vector.extract_strided_slice %147 {offsets = [0, 0], sizes = [8, 256], strides = [1, 1]} : vector<8x384xf32> to vector<8x256xf32>
    %150 = vector.extract_strided_slice %148 {offsets = [0, 0], sizes = [8, 256], strides = [1, 1]} : vector<8x384xf32> to vector<8x256xf32>
    %151 = arith.addf %149, %150 : vector<8x256xf32>
    %cst_50 = arith.constant 5.000000e-01 : f32
    %152 = vector.broadcast %cst_50 : f32 to vector<8x256xf32>
    %153 = arith.mulf %152, %151 : vector<8x256xf32>
    %154 = math.tanh %153 : vector<8x256xf32>
    %cst_51 = arith.constant 1.000000e+00 : f32
    %155 = vector.broadcast %cst_51 : f32 to vector<8x256xf32>
    %156 = arith.addf %154, %155 : vector<8x256xf32>
    %cst_52 = arith.constant 5.000000e-01 : f32
    %157 = vector.broadcast %cst_52 : f32 to vector<8x256xf32>
    %158 = arith.mulf %157, %156 : vector<8x256xf32>
    %159 = vector.extract_strided_slice %158 {offsets = [0, 0], sizes = [8, 128], strides = [1, 1]} : vector<8x256xf32> to vector<8x128xf32>
    %160 = vector.extract_strided_slice %158 {offsets = [0, 128], sizes = [8, 128], strides = [1, 1]} : vector<8x256xf32> to vector<8x128xf32>
    %161 = vector.extract_strided_slice %147 {offsets = [0, 256], sizes = [8, 128], strides = [1, 1]} : vector<8x384xf32> to vector<8x128xf32>
    %162 = vector.extract_strided_slice %148 {offsets = [0, 256], sizes = [8, 128], strides = [1, 1]} : vector<8x384xf32> to vector<8x128xf32>
    %163 = vector.broadcast %13 : vector<1x128xf32> to vector<8x128xf32>
    %164 = arith.addf %162, %163 : vector<8x128xf32>
    %165 = arith.mulf %159, %164 : vector<8x128xf32>
    %166 = arith.addf %161, %165 : vector<8x128xf32>
    %167 = math.tanh %166 : vector<8x128xf32>
    %168 = arith.subf %144, %167 : vector<8x128xf32>
    %169 = arith.mulf %160, %168 : vector<8x128xf32>
    %170 = arith.addf %167, %169 : vector<8x128xf32>
    %c6_i32 = arith.constant 6 : i32
    %171 = arith.index_cast %c6_i32 : i32 to index
    %c0_53 = arith.constant 0 : index
    %c0_54 = arith.constant 0 : index
    %172 = vector.load %arg12[%171, %c0_53, %c0_54] : memref<8x8x384xf32, #tpu.memory_space<vmem>>, vector<1x8x384xf32>
    %173 = vector.shape_cast %172 : vector<1x8x384xf32> to vector<8x384xf32>
    %cst_55 = arith.constant dense<0.000000e+00> : vector<8x384xf32>
    %174 = tpu.matmul %170, %12, %cst_55 {dimension_numbers = #tpu.dot_dimension_numbers<[1], [0], [0], [1], [0, 0, 1, 1], [], []>} : vector<8x128xf32>, vector<128x384xf32>, vector<8x384xf32> -> vector<8x384xf32>
    %175 = vector.extract_strided_slice %173 {offsets = [0, 0], sizes = [8, 256], strides = [1, 1]} : vector<8x384xf32> to vector<8x256xf32>
    %176 = vector.extract_strided_slice %174 {offsets = [0, 0], sizes = [8, 256], strides = [1, 1]} : vector<8x384xf32> to vector<8x256xf32>
    %177 = arith.addf %175, %176 : vector<8x256xf32>
    %cst_56 = arith.constant 5.000000e-01 : f32
    %178 = vector.broadcast %cst_56 : f32 to vector<8x256xf32>
    %179 = arith.mulf %178, %177 : vector<8x256xf32>
    %180 = math.tanh %179 : vector<8x256xf32>
    %cst_57 = arith.constant 1.000000e+00 : f32
    %181 = vector.broadcast %cst_57 : f32 to vector<8x256xf32>
    %182 = arith.addf %180, %181 : vector<8x256xf32>
    %cst_58 = arith.constant 5.000000e-01 : f32
    %183 = vector.broadcast %cst_58 : f32 to vector<8x256xf32>
    %184 = arith.mulf %183, %182 : vector<8x256xf32>
    %185 = vector.extract_strided_slice %184 {offsets = [0, 0], sizes = [8, 128], strides = [1, 1]} : vector<8x256xf32> to vector<8x128xf32>
    %186 = vector.extract_strided_slice %184 {offsets = [0, 128], sizes = [8, 128], strides = [1, 1]} : vector<8x256xf32> to vector<8x128xf32>
    %187 = vector.extract_strided_slice %173 {offsets = [0, 256], sizes = [8, 128], strides = [1, 1]} : vector<8x384xf32> to vector<8x128xf32>
    %188 = vector.extract_strided_slice %174 {offsets = [0, 256], sizes = [8, 128], strides = [1, 1]} : vector<8x384xf32> to vector<8x128xf32>
    %189 = vector.broadcast %13 : vector<1x128xf32> to vector<8x128xf32>
    %190 = arith.addf %188, %189 : vector<8x128xf32>
    %191 = arith.mulf %185, %190 : vector<8x128xf32>
    %192 = arith.addf %187, %191 : vector<8x128xf32>
    %193 = math.tanh %192 : vector<8x128xf32>
    %194 = arith.subf %170, %193 : vector<8x128xf32>
    %195 = arith.mulf %186, %194 : vector<8x128xf32>
    %196 = arith.addf %193, %195 : vector<8x128xf32>
    %c7_i32 = arith.constant 7 : i32
    %197 = arith.index_cast %c7_i32 : i32 to index
    %c0_59 = arith.constant 0 : index
    %c0_60 = arith.constant 0 : index
    %198 = vector.load %arg12[%197, %c0_59, %c0_60] : memref<8x8x384xf32, #tpu.memory_space<vmem>>, vector<1x8x384xf32>
    %199 = vector.shape_cast %198 : vector<1x8x384xf32> to vector<8x384xf32>
    %cst_61 = arith.constant dense<0.000000e+00> : vector<8x384xf32>
    %200 = tpu.matmul %196, %12, %cst_61 {dimension_numbers = #tpu.dot_dimension_numbers<[1], [0], [0], [1], [0, 0, 1, 1], [], []>} : vector<8x128xf32>, vector<128x384xf32>, vector<8x384xf32> -> vector<8x384xf32>
    %201 = vector.extract_strided_slice %199 {offsets = [0, 0], sizes = [8, 256], strides = [1, 1]} : vector<8x384xf32> to vector<8x256xf32>
    %202 = vector.extract_strided_slice %200 {offsets = [0, 0], sizes = [8, 256], strides = [1, 1]} : vector<8x384xf32> to vector<8x256xf32>
    %203 = arith.addf %201, %202 : vector<8x256xf32>
    %cst_62 = arith.constant 5.000000e-01 : f32
    %204 = vector.broadcast %cst_62 : f32 to vector<8x256xf32>
    %205 = arith.mulf %204, %203 : vector<8x256xf32>
    %206 = math.tanh %205 : vector<8x256xf32>
    %cst_63 = arith.constant 1.000000e+00 : f32
    %207 = vector.broadcast %cst_63 : f32 to vector<8x256xf32>
    %208 = arith.addf %206, %207 : vector<8x256xf32>
    %cst_64 = arith.constant 5.000000e-01 : f32
    %209 = vector.broadcast %cst_64 : f32 to vector<8x256xf32>
    %210 = arith.mulf %209, %208 : vector<8x256xf32>
    %211 = vector.extract_strided_slice %210 {offsets = [0, 0], sizes = [8, 128], strides = [1, 1]} : vector<8x256xf32> to vector<8x128xf32>
    %212 = vector.extract_strided_slice %210 {offsets = [0, 128], sizes = [8, 128], strides = [1, 1]} : vector<8x256xf32> to vector<8x128xf32>
    %213 = vector.extract_strided_slice %199 {offsets = [0, 256], sizes = [8, 128], strides = [1, 1]} : vector<8x384xf32> to vector<8x128xf32>
    %214 = vector.extract_strided_slice %200 {offsets = [0, 256], sizes = [8, 128], strides = [1, 1]} : vector<8x384xf32> to vector<8x128xf32>
    %215 = vector.broadcast %13 : vector<1x128xf32> to vector<8x128xf32>
    %216 = arith.addf %214, %215 : vector<8x128xf32>
    %217 = arith.mulf %211, %216 : vector<8x128xf32>
    %218 = arith.addf %213, %217 : vector<8x128xf32>
    %219 = math.tanh %218 : vector<8x128xf32>
    %220 = arith.subf %196, %219 : vector<8x128xf32>
    %221 = arith.mulf %212, %220 : vector<8x128xf32>
    %222 = arith.addf %219, %221 : vector<8x128xf32>
    %c8_i32 = arith.constant 8 : i32
    %c0_65 = arith.constant 0 : index
    %c0_66 = arith.constant 0 : index
    %223 = vector.load %arg11[%c0_65, %c0_66] : memref<8x128xf32, #tpu.memory_space<vmem>>, vector<8x128xf32>
    tpu.vector_store %arg11[%c0_65, %c0_66], %222 {strides = array<i32>} : memref<8x128xf32, #tpu.memory_space<vmem>>, vector<8x128xf32>,
    %c0_i32_67 = arith.constant 0 : i32
    %224 = arith.cmpi eq, %arg1, %c0_i32_67 : i32
    %225 = arith.extui %224 : i1 to i32
    %c0_i32_68 = arith.constant 0 : i32
    %226 = arith.cmpi ne, %225, %c0_i32_68 : i32
    scf.if %226 {
      %c0_69 = arith.constant 0 : index
      %c0_70 = arith.constant 0 : index
      %227 = vector.load %arg8[%c0_69, %c0_70] : memref<128x128xf32, #tpu.memory_space<vmem>>, vector<128x128xf32>
      %cst_71 = arith.constant dense<0.000000e+00> : vector<8x128xf32>
      %228 = tpu.matmul %222, %227, %cst_71 {dimension_numbers = #tpu.dot_dimension_numbers<[1], [0], [0], [1], [0, 0, 1, 1], [], []>} : vector<8x128xf32>, vector<128x128xf32>, vector<8x128xf32> -> vector<8x128xf32>
      %c0_72 = arith.constant 0 : index
      %c0_73 = arith.constant 0 : index
      %229 = vector.load %arg9[%c0_72, %c0_73] : memref<1x128xf32, #tpu.memory_space<vmem>>, vector<1x128xf32>
      %230 = vector.broadcast %229 : vector<1x128xf32> to vector<8x128xf32>
      %231 = arith.addf %228, %230 : vector<8x128xf32>
      %cst_74 = arith.constant dense<0xFF800000> : vector<8xf32>
      %232 = vector.multi_reduction <maximumf>, %231, %cst_74 [1] : vector<8x128xf32> to vector<8xf32>
      %233 = vector.shape_cast %232 : vector<8xf32> to vector<8x1xf32>
      %234 = vector.broadcast %233 : vector<8x1xf32> to vector<8x128xf32>
      %235 = arith.subf %231, %234 : vector<8x128xf32>
      %236 = math.exp %235 : vector<8x128xf32>
      %cst_75 = arith.constant dense<0.000000e+00> : vector<8xf32>
      %237 = vector.multi_reduction <add>, %236, %cst_75 [1] : vector<8x128xf32> to vector<8xf32>
      %238 = vector.shape_cast %237 : vector<8xf32> to vector<8x1xf32>
      %239 = math.log %238 : vector<8x1xf32>
      %240 = arith.addf %239, %233 : vector<8x1xf32>
      %241 = vector.broadcast %240 : vector<8x1xf32> to vector<8x128xf32>
      %242 = arith.subf %231, %241 : vector<8x128xf32>
      %c0_76 = arith.constant 0 : index
      %c0_77 = arith.constant 0 : index
      %243 = vector.load %arg10[%c0_76, %c0_77] : memref<8x128xf32, #tpu.memory_space<vmem>>, vector<8x128xf32>
      tpu.vector_store %arg10[%c0_76, %c0_77], %242 {strides = array<i32>} : memref<8x128xf32, #tpu.memory_space<vmem>>, vector<8x128xf32>,
    } else {
    }
    return
  }
  func.func @transform_0(%arg0: i32, %arg1: i32) -> (i32, i32, i32) {
    %c0_i32 = arith.constant 0 : i32
    %c0_i32_0 = arith.constant 0 : i32
    return %arg1, %arg0, %c0_i32 : i32, i32, i32
  }
  func.func @transform_1(%arg0: i32, %arg1: i32) -> (i32, i32) {
    %c0_i32 = arith.constant 0 : i32
    %c0_i32_0 = arith.constant 0 : i32
    return %arg0, %c0_i32 : i32, i32
  }
  func.func @transform_2(%arg0: i32, %arg1: i32) -> (i32, i32) {
    %c0_i32 = arith.constant 0 : i32
    %c0_i32_0 = arith.constant 0 : i32
    %c0_i32_1 = arith.constant 0 : i32
    return %c0_i32, %c0_i32_0 : i32, i32
  }
  func.func @transform_3(%arg0: i32, %arg1: i32) -> (i32, i32) {
    %c0_i32 = arith.constant 0 : i32
    %c0_i32_0 = arith.constant 0 : i32
    %c0_i32_1 = arith.constant 0 : i32
    return %c0_i32, %c0_i32_0 : i32, i32
  }
  func.func @transform_4(%arg0: i32, %arg1: i32) -> (i32, i32) {
    %c0_i32 = arith.constant 0 : i32
    %c0_i32_0 = arith.constant 0 : i32
    %c0_i32_1 = arith.constant 0 : i32
    return %c0_i32, %c0_i32_0 : i32, i32
  }
  func.func @transform_5(%arg0: i32, %arg1: i32) -> (i32, i32) {
    %c0_i32 = arith.constant 0 : i32
    %c0_i32_0 = arith.constant 0 : i32
    %c0_i32_1 = arith.constant 0 : i32
    return %c0_i32, %c0_i32_0 : i32, i32
  }
  func.func @transform_6(%arg0: i32, %arg1: i32) -> (i32, i32) {
    %c0_i32 = arith.constant 0 : i32
    %c0_i32_0 = arith.constant 0 : i32
    %c0_i32_1 = arith.constant 0 : i32
    return %c0_i32, %c0_i32_0 : i32, i32
  }
  func.func @transform_7(%arg0: i32, %arg1: i32) -> (i32, i32) {
    %c0_i32 = arith.constant 0 : i32
    %c0_i32_0 = arith.constant 0 : i32
    %c0_i32_1 = arith.constant 0 : i32
    return %c0_i32, %c0_i32_0 : i32, i32
  }
  func.func @transform_8(%arg0: i32, %arg1: i32) -> (i32, i32) {
    %c0_i32 = arith.constant 0 : i32
    %c0_i32_0 = arith.constant 0 : i32
    return %arg0, %c0_i32 : i32, i32
  }
  func.func @transform_9(%arg0: i32, %arg1: i32) -> (i32, i32) {
    %c0_i32 = arith.constant 0 : i32
    %c0_i32_0 = arith.constant 0 : i32
    return %arg0, %c0_i32 : i32, i32
  }
}

</mosaic_0001>

<bundles_post_ra>
// kernel: tpu_custom_call.1
= control target key start
LH: loop header
LB: loop body
LE: loop exit
PB: predicated region body
PF: predicated region fallthrough
CT: control target
= control target key end

     0   :  { %15 = vsyncpa [#allocation4], 0  ;;  %s3740_s0 = inlined_call_operand.hbm [shape: f32[8,8,16], index: 0, kind: input, shape index: {}]   ;;  %s3741_s1 = inlined_call_operand.hbm [shape: f32[8,128], index: 1, kind: input, shape index: {}]   ;;  %s3742_s2 = inlined_call_operand.hbm [shape: f32[16,384], index: 2, kind: input, shape index: {}]   ;;  %s3743_s3 = inlined_call_operand.hbm [shape: f32[128,384], index: 3, kind: input, shape index: {}]   ;;  %s3744_s4 = inlined_call_operand.vmem [shape: f32[1,384], index: 4, kind: input, shape index: {}]   ;;  %s3745_s5 = inlined_call_operand.vmem [shape: f32[1,128], index: 5, kind: input, shape index: {}]   ;;  %s3746_s6 = inlined_call_operand.hbm [shape: f32[128,128], index: 6, kind: input, shape index: {}]   ;;  %s3747_s7 = inlined_call_operand.vmem [shape: f32[1,128], index: 7, kind: input, shape index: {}]   ;;  %s3748_s8 = inlined_call_operand.hbm [shape: f32[8,128], index: 8, kind: output, shape index: {0}]   ;;  %s3749_s9 = inlined_call_operand.hbm [shape: f32[8,128], index: 9, kind: output, shape index: {1}]  }
   0x1   :  { %16 = vsyncpa [#allocation7], 0 }
   0x2   :  { %17 = vsyncpa [#allocation10], 0 }
   0x3   :  { %18 = vsyncpa [#allocation5], 0 }
   0x4   :  { %19 = vsyncpa [#allocation14], 0  ;;  %s3148_s30 = smov [#allocation6]   ;;  %s2984_s13 = scalar_lea.hbm %s3741_s1, 128 }
   0x5   :  { %s38_s10 = sshll.u32 %s3148_s30, 4  ;;  %p2985_p0 = scmp.ne.s32.totalorder %s3741_s1, %s2984_s13  ;;  %s39_s10 = int_to_ptr.vmem [resolvable:$true] %s38_s10 }
   0x6   :  { %p2988_p1 = scmp.lt.u32.totalorder %s2984_s13, %s3741_s1 }
   0x8   :  { %p2990_p2 = pnand %p2988_p1, %p2985_p0 }
   0xa   :  { %2993 = shalt.err (!%p2990_p2)
}
   0xb   :  { %s2994_s18 = scalar_lea.vmem %s39_s10, 128  ;;  %p2999_p4 = scmp.lt.s32.totalorder %s39_s10, %s39_s10 }
   0xc   :  { %p2995_p3 = scmp.ne.s32.totalorder %s39_s10, %s2994_s18  ;;  %p3000_p5 = scmp.lt.s32.totalorder %s2994_s18, %s2994_s18 }
   0xe   :  { %p3001_p6 = por %p3000_p5, %p2999_p4 }
  0x10   :  { %p3002_p7 = pnand %p3001_p6, %p2995_p3 }
  0x12   :  { %3005 = shalt.err (!%p3002_p7)
}
  0x13   :  { %41 = dma.hbm_to_vmem [thread:$0]  %s3741_s1, 128, %s39_s10, [#allocation7]  }
  0x14   :  { %s3149_s21 = smov [#allocation9]   ;;  %s3150_s23 = smov [#allocation3]  }
  0x15   :  { %s59_s22 = sshll.u32 %s3149_s21, 4  ;;  %s25_s24 = sshll.u32 %s3150_s23, 4  ;;  %s60_s22 = int_to_ptr.vmem [resolvable:$true] %s59_s22  ;;  %s26_s24 = int_to_ptr.vmem [resolvable:$true] %s25_s24 }
  0x16   :  { %s3006_s27 = scalar_lea.hbm %s3743_s3, 6144 }
  0x17   :  { %p3007_p8 = scmp.ne.s32.totalorder %s3743_s3, %s3006_s27  ;;  %p3010_p9 = scmp.lt.u32.totalorder %s3006_s27, %s3743_s3 }
  0x19   :  { %p3012_p10 = pnand %p3010_p9, %p3007_p8 }
  0x1b   :  { %3015 = shalt.err (!%p3012_p10)
}
  0x1c   :  { %s3016_s1 = scalar_lea.vmem %s60_s22, 6144  ;;  %p3021_p12 = scmp.lt.s32.totalorder %s60_s22, %s60_s22 }
  0x1d   :  { %p3017_p11 = scmp.ne.s32.totalorder %s60_s22, %s3016_s1  ;;  %p3022_p13 = scmp.lt.s32.totalorder %s3016_s1, %s3016_s1 }
  0x1f   :  { %p3023_p0 = por %p3022_p13, %p3021_p12 }
  0x21   :  { %p3024_p1 = pnand %p3023_p0, %p3017_p11 }
  0x23   :  { %3027 = shalt.err (!%p3024_p1)
}
  0x24   :  { %s3151_s10 = smov 384   ;;  %s3152_s12 = smov 24  }
  0x25   :  { %65 = dma.hbm_to_vmem [thread:$0]  %s3743_s3, 6144, %s60_s22, [#allocation10], %s3151_s10, %s3151_s10, %s3152_s12  }
  0x26   :  { %s3028_s17 = scalar_lea.hbm %s3740_s0, 1024 }
  0x27   :  { %p3029_p2 = scmp.ne.s32.totalorder %s3740_s0, %s3028_s17  ;;  %p3032_p3 = scmp.lt.u32.totalorder %s3028_s17, %s3740_s0 }
  0x29   :  { %p3034_p4 = pnand %p3032_p3, %p3029_p2 }
  0x2b   :  { %3037 = shalt.err (!%p3034_p4)
}
  0x2c   :  { %s3038_s23 = scalar_lea.vmem %s26_s24, 1024  ;;  %p3043_p6 = scmp.lt.s32.totalorder %s26_s24, %s26_s24 }
  0x2d   :  { %p3039_p5 = scmp.ne.s32.totalorder %s26_s24, %s3038_s23  ;;  %p3044_p7 = scmp.lt.s32.totalorder %s3038_s23, %s3038_s23 }
  0x2f   :  { %p3045_p8 = por %p3044_p7, %p3043_p6 }
  0x31   :  { %p3046_p9 = pnand %p3045_p8, %p3039_p5 }
  0x33   :  { %3049 = shalt.err (!%p3046_p9)
}
  0x34   :  { %s3153_s3 = smov 128   ;;  %s3154_s22 = smov 8  }
  0x35   :  { %31 = dma.hbm_to_vmem [thread:$0]  %s3740_s0, 1024, %s26_s24, [#allocation4], %s3153_s3, %s3153_s3, %s3154_s22  }
  0x36   :  { %s3155_s27 = smov [#allocation8]   ;;  %s3156_s29 = smov [#allocation11]  }
  0x37   :  { %s47_s28 = sshll.u32 %s3155_s27, 4  ;;  %s75_s30 = sshll.u32 %s3156_s29, 4  ;;  %s48_s28 = int_to_ptr.vmem [resolvable:$true] %s47_s28  ;;  %s76_s30 = int_to_ptr.vmem [resolvable:$true] %s75_s30 }
  0x38   :  { %s3050_s13 = scalar_lea.hbm %s3742_s2, 768 }
  0x39   :  { %p3051_p10 = scmp.ne.s32.totalorder %s3742_s2, %s3050_s13  ;;  %p3054_p11 = scmp.lt.u32.totalorder %s3050_s13, %s3742_s2 }
  0x3b   :  { %p3056_p12 = pnand %p3054_p11, %p3051_p10 }
  0x3d   :  { %3059 = shalt.err (!%p3056_p12)
}
  0x3e   :  { %s3060_s0 = scalar_lea.vmem %s48_s28, 768  ;;  %p3065_p0 = scmp.lt.s32.totalorder %s48_s28, %s48_s28 }
  0x3f   :  { %p3061_p13 = scmp.ne.s32.totalorder %s48_s28, %s3060_s0  ;;  %p3066_p1 = scmp.lt.s32.totalorder %s3060_s0, %s3060_s0 }
  0x41   :  { %p3067_p2 = por %p3066_p1, %p3065_p0 }
  0x43   :  { %p3068_p3 = pnand %p3067_p2, %p3061_p13 }
  0x45   :  { %3071 = shalt.err (!%p3068_p3)
}
  0x46   :  { %53 = dma.hbm_to_vmem [thread:$0]  %s3742_s2, 768, %s48_s28, [#allocation7], %s3151_s10, %s3151_s10, %s3152_s12  }
  0x47   :  { %s3072_s21 = scalar_lea.hbm %s3746_s6, 2048 }
  0x48   :  { %p3073_p4 = scmp.ne.s32.totalorder %s3746_s6, %s3072_s21  ;;  %p3076_p5 = scmp.lt.u32.totalorder %s3072_s21, %s3746_s6 }
  0x4a   :  { %p3078_p6 = pnand %p3076_p5, %p3073_p4 }
  0x4c   :  { %3081 = shalt.err (!%p3078_p6)
}
  0x4d   :  { %s3082_s29 = scalar_lea.vmem %s76_s30, 2048  ;;  %p3087_p8 = scmp.lt.s32.totalorder %s76_s30, %s76_s30 }
  0x4e   :  { %p3083_p7 = scmp.ne.s32.totalorder %s76_s30, %s3082_s29  ;;  %p3088_p9 = scmp.lt.s32.totalorder %s3082_s29, %s3082_s29 }
  0x50   :  { %p3089_p10 = por %p3088_p9, %p3087_p8 }
  0x52   :  { %p3090_p11 = pnand %p3089_p10, %p3083_p7 }
  0x54   :  { %3093 = shalt.err (!%p3090_p11)
}
  0x55   :  { %81 = dma.hbm_to_vmem [thread:$0]  %s3746_s6, 2048, %s76_s30, [#allocation10], %s3153_s3, %s3153_s3, %s3154_s22  }
  0x56   :  { %3138 = dma.done.wait [#allocation4], 1024  }
  0x57   :  { %3139 = vsyncadd [#allocation4], 4294966272 }
  0x58   :  { %3140 = dma.done.wait [#allocation7], 896  }
  0x59   :  { %3141 = vsyncadd [#allocation7], 4294966400 }
  0x5a   :  { %3142 = dma.done.wait [#allocation10], 8192  }
  0x5b   :  { %3143 = vsyncadd [#allocation10], 4294959104  ;;  %v3157_v0 = vmov 0.0   ;;  %v114_v1 = vld [vmem:[#allocation8 + $0x8] sm:$0xff]  ;;  %v117_v2 = vld [vmem:[#allocation8 + $0x20] sm:$0xff]  ;;  %vm136_vm0 = vcmask 130048  }
  0x5c   :  { %225 = vmatprep.mubr.f32.mxu0 %v3157_v0  ;;  %v113_v3 = vld [vmem:[#allocation8] sm:$0xff]  ;;  %v2406_v4 = vpack.c.bf16 %v117_v2, %v114_v1  ;;  %v116_v5 = vld [vmem:[#allocation8 + $0x18] sm:$0xff]  ;;  %v407_v9 = vld [vmem:[#allocation9 + $0x20] sm:$0xff]  ;;  %v3158_v40 = vmov 0.0|0.0   ;;  %vm3159_vm1 = vmmov 0   ;;  %s3160_s28 = smov [#allocation13]  }
  0x5d   :  { %v105_v6 = vld [vmem:[#allocation3] sm:$0xff]  ;;  %v2408_v8 = vpack.c.bf16 %v116_v5, %v113_v3  ;;  %v403_v10 = vld [vmem:[#allocation9] sm:$0xff]  ;;  %v406_v11 = vld [vmem:[#allocation9 + $0x18] sm:$0xff]  ;;  %s1879_s30 = sshll.u32 %s3160_s28, 4  ;;  %s1880_s30 = int_to_ptr.vmem [resolvable:$true] %s1879_s30 }
  0x5e   :  { %v404_v7 = vld [vmem:[#allocation9 + $0x8] sm:$0xff]  ;;  %2079 = vmatprep.mubr.msk.f32.mxu1 %vm136_vm0, %v105_v6  ;;  %2407 = vmatprep.subr.bf16.mxu0 %v2406_v4  ;;  %v410_v13 = vld [vmem:[#allocation9 + $0x38] sm:$0xff]  ;;  %v413_v14 = vld [vmem:[#allocation9 + $0x50] sm:$0xff]  ;;  %v3288_v15 = vpack.c.bf16 %v406_v11, %v403_v10  ;;  %s3094_s11 = scalar_lea.vmem %s1880_s30, 128  ;;  %p3099_p13 = scmp.lt.s32.totalorder %s1880_s30, %s1880_s30 }
  0x5f   :  { %v3286_v12 = vpack.c.bf16 %v407_v9, %v404_v7  ;;  %2409 = vmatpush1.bf16.msra.mxu0 %v2408_v8  ;;  %v3291_v16 = vpack.c.bf16 %v413_v14, %v410_v13  ;;  %v409_v17 = vld [vmem:[#allocation9 + $0x30] sm:$0xff]  ;;  %v412_v18 = vld [vmem:[#allocation9 + $0x48] sm:$0xff]  ;;  %v419_v20 = vld [vmem:[#allocation9 + $0x80] sm:$0xff]  ;;  %p3095_p12 = scmp.ne.s32.totalorder %s1880_s30, %s3094_s11  ;;  %p3100_p0 = scmp.lt.s32.totalorder %s3094_s11, %s3094_s11 }
  0x60   :  { %v416_v19 = vld [vmem:[#allocation9 + $0x68] sm:$0xff]  ;;  %v115_v21 = vld [vmem:[#allocation8 + $0x10] sm:$0xff]  ;;  %v118_v22 = vld [vmem:[#allocation8 + $0x28] sm:$0xff]  ;;  %v3296_v24 = vpack.c.bf16 %v412_v18, %v409_v17 }
  0x61   :  { %2415 = vmatprep.subr.bf16.mxu0 %v3286_v12  ;;  %v106_v23 = vld [vmem:[#allocation3 + $0x8] sm:$0xff]  ;;  %v2410_v25 = vpack.c.bf16 %v118_v22, %v115_v21  ;;  %v3299_v26 = vpack.c.bf16 %v419_v20, %v416_v19  ;;  %v415_v27 = vld [vmem:[#allocation9 + $0x60] sm:$0xff]  ;;  %v418_v28 = vld [vmem:[#allocation9 + $0x78] sm:$0xff]  ;;  %p3101_p1 = por %p3100_p0, %p3099_p13 }
  0x62   :  { %1894 = vmatmul.mubr.msk.f32.vlgmr.msra.gmra.mrb[0].mxu0 %vm136_vm0, %v105_v6  ;;  %v422_v29 = vld [vmem:[#allocation9 + $0x98] sm:$0xff]  ;;  %v425_v30 = vld [vmem:[#allocation9 + $0xb0] sm:$0xff]  ;;  %v408_v32 = vld [vmem:[#allocation9 + $0x28] sm:$0xff]  ;;  %v3306_v35 = vpack.c.bf16 %v418_v28, %v415_v27 }
  0x63   :  { %2417 = vmatpush1.bf16.msra.mxu0 %v3288_v15  ;;  %231 = vmatprep.mubr.f32.mxu0 %v3157_v0  ;;  %v405_v31 = vld [vmem:[#allocation9 + $0x10] sm:$0xff]  ;;  %v107_v34 = vld [vmem:[#allocation3 + $0x10] sm:$0xff]  ;;  %v411_v36 = vld [vmem:[#allocation9 + $0x40] sm:$0xff]  ;;  %v3309_v37 = vpack.c.bf16 %v425_v30, %v422_v29  ;;  %p3102_p2 = pnand %p3101_p1, %p3095_p12 }
  0x64   :  { %2419 = vmatprep.subr.bf16.mxu0 %v3291_v16  ;;  %2411 = vmatprep.subr.bf16.mxu1 %v2410_v25  ;;  %v3302_v33 = vpack.c.bf16 %v408_v32, %v405_v31  ;;  %v421_v38 = vld [vmem:[#allocation9 + $0x90] sm:$0xff]  ;;  %v424_v39 = vld [vmem:[#allocation9 + $0xa8] sm:$0xff]  ;;  %v414_v41 = vld [vmem:[#allocation9 + $0x58] sm:$0xff] }
  0x65   :  { %2413 = vmatpush3.bf16.msra.mxu1 %v2410_v25  ;;  %v428_v42 = vld [vmem:[#allocation9 + $0xc8] sm:$0xff]  ;;  %v431_v43 = vld [vmem:[#allocation9 + $0xe0] sm:$0xff]  ;;  %v3315_v44 = vpack.c.bf16 %v414_v41, %v411_v36  ;;  %v3319_v46 = vpack.c.bf16 %v424_v39, %v421_v38  ;;  %v417_v47 = vld [vmem:[#allocation9 + $0x70] sm:$0xff]  ;;  %v121_v36 = vlaneseq }
  0x66   :  { %1895 = vmatmul.mubr.msk.f32.gmra.mrb[2].mxu0 %vm136_vm0, %v106_v23  ;;  %2446 = vmatprep.subr.bf16.mxu1 %v3158_v40  ;;  %v108_v45 = vld [vmem:[#allocation3 + $0x18] sm:$0xff]  ;;  %v420_v48 = vld [vmem:[#allocation9 + $0x88] sm:$0xff]  ;;  %v3322_v49 = vpack.c.bf16 %v431_v43, %v428_v42  ;;  %v430_v51 = vld [vmem:[#allocation9 + $0xd8] sm:$0xff] }
  0x67   :  { %2421 = vmatpush1.bf16.msra.mxu0 %v3296_v24  ;;  %237 = vmatprep.mubr.f32.mxu0 %v3157_v0  ;;  %v427_v50 = vld [vmem:[#allocation9 + $0xc0] sm:$0xff]  ;;  %v434_v52 = vld [vmem:[#allocation9 + $0xf8] sm:$0xff]  ;;  %v437_v53 = vld [vmem:[#allocation9 + $0x110] sm:$0xff]  ;;  %v3328_v54 = vpack.c.bf16 %v420_v48, %v417_v47  ;;  %v122_v38 = vshrl.u32 %v121_v36, 7 }
  0x68   :  { %2423 = vmatprep.subr.bf16.mxu0 %v3299_v26  ;;  %2080 = vmatmul.mubr.msk.f32.vlgmr.msra.gmra.mrb[0].mxu1 %vm136_vm0, %v106_v23  ;;  %v109_v55 = vld [vmem:[#allocation3 + $0x20] sm:$0xff]  ;;  %v3332_v56 = vpack.c.bf16 %v430_v51, %v427_v50  ;;  %v423_v57 = vld [vmem:[#allocation9 + $0xa0] sm:$0xff]  ;;  %v426_v58 = vld [vmem:[#allocation9 + $0xb8] sm:$0xff]  ;;  %v3335_v59 = vpack.c.bf16 %v437_v53, %v434_v52 }
  0x69   :  { %2448 = vmatpush3.bf16.msra.mxu1 %v3302_v33  ;;  %2082 = vmatprep.mubr.msk.f32.mxu1 %vm136_vm0, %v107_v34  ;;  %v433_v60 = vld [vmem:[#allocation9 + $0xf0] sm:$0xff]  ;;  %v436_v61 = vld [vmem:[#allocation9 + $0x108] sm:$0xff]  ;;  %v443_v63 = vld [vmem:[#allocation9 + $0x140] sm:$0xff]  ;;  %v3341_v1 = vpack.c.bf16 %v426_v58, %v423_v57  ;;  %v131_v39 = vsub.s32 2, %v122_v38  ;;  %v123_v58 = vsub.s32 0, %v122_v38 }
  0x6a   :  { %1896 = vmatmul.mubr.msk.f32.gmra.mrb[4].mxu0 %vm136_vm0, %v107_v34  ;;  %2449 = vmatprep.subr.bf16.mxu1 %v3158_v40  ;;  %v440_v62 = vld [vmem:[#allocation9 + $0x128] sm:$0xff]  ;;  %v110_v2 = vld [vmem:[#allocation3 + $0x28] sm:$0xff]  ;;  %v3345_v3 = vpack.c.bf16 %v436_v61, %v433_v60  ;;  %v439_v7 = vld [vmem:[#allocation9 + $0x120] sm:$0xff] }
  0x6b   :  { %2425 = vmatpush1.bf16.msra.mxu0 %v3306_v35  ;;  %243 = vmatprep.mubr.f32.mxu0 %v3157_v0  ;;  %v429_v4 = vld [vmem:[#allocation9 + $0xd0] sm:$0xff]  ;;  %v432_v5 = vld [vmem:[#allocation9 + $0xe8] sm:$0xff]  ;;  %v3348_v6 = vpack.c.bf16 %v443_v63, %v440_v62  ;;  %v442_v8 = vld [vmem:[#allocation9 + $0x138] sm:$0xff] }
  0x6c   :  { %2427 = vmatprep.subr.bf16.mxu0 %v3309_v37  ;;  %2083 = vmatmul.mubr.msk.f32.gmra.mrb[2].mxu1 %vm136_vm0, %v108_v45  ;;  %v446_v9 = vld [vmem:[#allocation9 + $0x158] sm:$0xff]  ;;  %v449_v10 = vld [vmem:[#allocation9 + $0x170] sm:$0xff]  ;;  %v3354_v11 = vpack.c.bf16 %v432_v5, %v429_v4  ;;  %v3358_v14 = vpack.c.bf16 %v442_v8, %v439_v7  ;;  %v435_v17 = vld [vmem:[#allocation9 + $0x100] sm:$0xff] }
  0x6d   :  { %2451 = vmatpush3.bf16.msra.mxu1 %v3315_v44  ;;  %2085 = vmatprep.mubr.msk.f32.mxu1 %vm136_vm0, %v109_v55  ;;  %v111_v13 = vld [vmem:[#allocation3 + $0x30] sm:$0xff]  ;;  %v3361_v19 = vpack.c.bf16 %v449_v10, %v446_v9  ;;  %v445_v20 = vld [vmem:[#allocation9 + $0x150] sm:$0xff]  ;;  %v448_v21 = vld [vmem:[#allocation9 + $0x168] sm:$0xff]  ;;  %v127_v9 = vsub.s32 1, %v122_v38 }
  0x6e   :  { %1897 = vmatmul.mubr.msk.f32.gmra.mrb[6].mxu0 %vm136_vm0, %v108_v45  ;;  %2452 = vmatprep.subr.bf16.mxu1 %v3158_v40  ;;  %v438_v18 = vld [vmem:[#allocation9 + $0x118] sm:$0xff]  ;;  %v112_v23 = vld [vmem:[#allocation3 + $0x38] sm:$0xff]  ;;  %v3371_v25 = vpack.c.bf16 %v448_v21, %v445_v20  ;;  %v441_v27 = vld [vmem:[#allocation9 + $0x130] sm:$0xff] }
  0x6f   :  { %2429 = vmatpush1.bf16.msra.mxu0 %v3319_v46  ;;  %249 = vmatprep.mubr.f32.mxu0 %v3157_v0  ;;  %v3367_v22 = vpack.c.bf16 %v438_v18, %v435_v17  ;;  %v444_v28 = vld [vmem:[#allocation9 + $0x148] sm:$0xff]  ;;  %v447_v31 = vld [vmem:[#allocation9 + $0x160] sm:$0xff]  ;;  %v450_v32 = vld [vmem:[#allocation9 + $0x178] sm:$0xff] }
  0x70   :  { %2431 = vmatprep.subr.bf16.mxu0 %v3322_v49  ;;  %2086 = vmatmul.mubr.msk.f32.gmra.mrb[4].mxu1 %vm136_vm0, %v110_v2  ;;  %v3378_v29 = vpack.c.bf16 %v444_v28, %v441_v27  ;;  %v3382_v30 = vld [vmem:[#allocation6] sm:$0xff]  ;;  %v3391_v34 = vpack.c.bf16 %v450_v32, %v447_v31 }
  0x71   :  { %2454 = vmatpush3.bf16.msra.mxu1 %v3328_v54  ;;  %2088 = vmatprep.mubr.msk.f32.mxu1 %vm136_vm0, %v111_v13  ;;  %v119_v41 = vld [vmem:[%s3744_s4] sm:$0x7] }
  0x72   :  { %1898 = vmatmul.mubr.msk.f32.gmra.mrb[8].mxu0 %vm136_vm0, %v109_v55  ;;  %2455 = vmatprep.subr.bf16.mxu1 %v3158_v40  ;;  %v132_v42 = vrot.slane %v119_v41, %v131_v39  ;;  %v3445_v61 = vrot.slane %v119_v41, %v123_v58  ;;  %v3458_v21 = vld [vmem:[%s3745_s5] ss:$0 sm:$0xff] }
  0x73   :  { %2433 = vmatpush1.bf16.msra.mxu0 %v3332_v56  ;;  %255 = vmatprep.mubr.f32.mxu0 %v3157_v0 }
  0x74   :  { %2435 = vmatprep.subr.bf16.mxu0 %v3335_v59  ;;  %2089 = vmatmul.mubr.msk.f32.gmra.mrb[6].mxu1 %vm136_vm0, %v112_v23 }
  0x75   :  { %2457 = vmatpush3.bf16.msra.mxu1 %v3341_v1  ;;  %2123 = vmatprep.mubr.msk.f32.mxu1 %vm3159_vm1, %v3157_v0 }
  0x76   :  { %1899 = vmatmul.mubr.msk.f32.gmra.mrb[10].mxu0 %vm136_vm0, %v110_v2  ;;  %2458 = vmatprep.subr.bf16.mxu1 %v3158_v40 }
  0x77   :  { %2437 = vmatpush1.bf16.msra.mxu0 %v3345_v3  ;;  %261 = vmatprep.mubr.f32.mxu0 %v3157_v0 }
  0x78   :  { %2439 = vmatprep.subr.bf16.mxu0 %v3348_v6 }
  0x79   :  { %2460 = vmatpush3.bf16.msra.mxu1 %v3354_v11 }
  0x7a   :  { %1900 = vmatmul.mubr.msk.f32.gmra.mrb[12].mxu0 %vm136_vm0, %v111_v13  ;;  %2461 = vmatprep.subr.bf16.mxu1 %v3158_v40  ;;  %v3452_v13 = vrot.slane %v119_v41, %v127_v9 }
  0x7b   :  { %2441 = vmatpush1.bf16.msra.mxu0 %v3358_v14  ;;  %267 = vmatprep.mubr.f32.mxu0 %v3157_v0 }
  0x7c   :  { %2443 = vmatprep.subr.bf16.mxu0 %v3361_v19 }
  0x7d   :  { %2463 = vmatpush3.bf16.msra.mxu1 %v3367_v22 }
  0x7e   :  { %1901 = vmatmul.mubr.msk.f32.gmra.mrb[14].mxu0 %vm136_vm0, %v112_v23  ;;  %2464 = vmatprep.subr.bf16.mxu1 %v3158_v40 }
  0x7f   :  { %2445 = vmatpush1.bf16.msra.mxu0 %v3371_v25  ;;  %520 = vmatprep.mubr.f32.mxu0 %v3157_v0 }
  0x80   :  { %2471 = vmatprep.subr.bf16.mxu0 %v3286_v12 }
  0x81   :  { %2466 = vmatpush3.bf16.msra.mxu1 %v3378_v29 }
  0x82   :  { %521 = vmatmul.mubr.f32.vlgmr.msra.gmra.mrb[0].mxu0 %v3382_v30  ;;  %2467 = vmatprep.subr.bf16.mxu1 %v3158_v40 }
  0x83   :  { %2473 = vmatpush1.bf16.msra.mxu0 %v3288_v15  ;;  %688 = vmatprep.mubr.f32.mxu0 %v3157_v0 }
  0x84   :  { %2475 = vmatprep.subr.bf16.mxu0 %v3291_v16 }
  0x85   :  { %2469 = vmatpush3.bf16.msra.mxu1 %v3391_v34 }
  0x86   :  { %2502 = vmatprep.subr.bf16.mxu1 %v3158_v40 }
  0x87   :  { %2477 = vmatpush1.bf16.msra.mxu0 %v3296_v24 }
  0x88   :  { %2479 = vmatprep.subr.bf16.mxu0 %v3299_v26  ;;  %2124 = vmatmul.mubr.f32.vlgmr.msra.gmra.mrb[8].mxu1 %v3382_v30 }
  0x89   :  { %2504 = vmatpush3.bf16.msra.mxu1 %v3302_v33  ;;  %2158 = vmatprep.mubr.msk.f32.mxu1 %vm3159_vm1, %v3157_v0 }
  0x8a   :  { %2505 = vmatprep.subr.bf16.mxu1 %v3158_v40 }
  0x8b   :  { %2481 = vmatpush1.bf16.msra.mxu0 %v3306_v35 }
  0x8c   :  { %2483 = vmatprep.subr.bf16.mxu0 %v3309_v37 }
  0x8d   :  { %2507 = vmatpush3.bf16.msra.mxu1 %v3315_v44 }
  0x8e   :  { %2508 = vmatprep.subr.bf16.mxu1 %v3158_v40 }
  0x8f   :  { %2485 = vmatpush1.bf16.msra.mxu0 %v3319_v46 }
  0x90   :  { %2487 = vmatprep.subr.bf16.mxu0 %v3322_v49 }
  0x91   :  { %2510 = vmatpush3.bf16.msra.mxu1 %v3328_v54 }
  0x92   :  { %2511 = vmatprep.subr.bf16.mxu1 %v3158_v40 }
  0x93   :  { %2489 = vmatpush1.bf16.msra.mxu0 %v3332_v56 }
  0x94   :  { %2491 = vmatprep.subr.bf16.mxu0 %v3335_v59 }
  0x95   :  { %2513 = vmatpush3.bf16.msra.mxu1 %v3341_v1 }
  0x96   :  { %2514 = vmatprep.subr.bf16.mxu1 %v3158_v40 }
  0x97   :  { %2493 = vmatpush1.bf16.msra.mxu0 %v3345_v3 }
  0x98   :  { %2495 = vmatprep.subr.bf16.mxu0 %v3348_v6 }
  0x99   :  { %2516 = vmatpush3.bf16.msra.mxu1 %v3354_v11 }
  0x9a   :  { %2517 = vmatprep.subr.bf16.mxu1 %v3158_v40 }
  0x9b   :  { %2497 = vmatpush1.bf16.msra.mxu0 %v3358_v14 }
  0x9c   :  { %2499 = vmatprep.subr.bf16.mxu0 %v3361_v19 }
  0x9d   :  { %2519 = vmatpush3.bf16.msra.mxu1 %v3367_v22 }
  0x9e   :  { %2520 = vmatprep.subr.bf16.mxu1 %v3158_v40 }
  0x9f   :  { %2501 = vmatpush1.bf16.msra.mxu0 %v3371_v25 }
  0xa0   :  { %2527 = vmatprep.subr.bf16.mxu0 %v3286_v12 }
  0xa1   :  { %2522 = vmatpush3.bf16.msra.mxu1 %v3378_v29 }
  0xa2   :  { %2523 = vmatprep.subr.bf16.mxu1 %v3158_v40 }
  0xa5   :  { %2525 = vmatpush3.bf16.msra.mxu1 %v3391_v34 }
  0xa6   :  { %2558 = vmatprep.subr.bf16.mxu1 %v3158_v40 }
 0x13b   :  { %v2081_v43 = vpop.f32.mrb[0].mxu1 }
 0x13c   :  { %v3435_v45 = vadd.f32 %v2081_v43, %v132_v42  ;;  %v340_v47 = vpop.f32.mrb[1].mxu1 }
 0x13d   :  { %v341_v36 = vadd.f32 %v340_v47, %v132_v42 }
 0x13f   :  { %v2084_v48 = vpop.f32.mrb[2].mxu1 }
 0x140   :  { %v3437_v50 = vadd.f32 %v2084_v48, %v132_v42  ;;  %v350_v51 = vpop.f32.mrb[3].mxu1 }
 0x141   :  { %v3439_v52 = vadd.f32 %v350_v51, %v132_v42 }
 0x143   :  { %v2087_v53 = vpop.f32.mrb[4].mxu1 }
 0x144   :  { %v3441_v55 = vadd.f32 %v2087_v53, %v132_v42  ;;  %v360_v57 = vpop.f32.mrb[5].mxu1 }
 0x145   :  { %v3443_v60 = vadd.f32 %v360_v57, %v132_v42 }
 0x147   :  { %v2090_v62 = vpop.f32.mrb[6].mxu1 }
 0x148   :  { %v3447_v63 = vadd.f32 %v2090_v62, %v132_v42  ;;  %v370_v2 = vpop.f32.mrb[7].mxu1 }
 0x149   :  { %v3449_v5 = vadd.f32 %v370_v2, %v132_v42 }
 0x155   :  { %v522_v4 = vpop.f32.mrb[0].mxu0 }
 0x156   :  { %v2886_v7 = vadd.f32 %v522_v4, %v3445_v61  ;;  %v524_v8 = vpop.f32.mrb[1].mxu0 }
 0x157   :  { %v2887_v20 = vadd.f32 %v524_v8, %v3452_v13 }
 0x158   :  { %v599_v10 = vmul.f32 0.5, %v2886_v7 }
 0x159   :  { %v600_v23 = vmul.f32 0.5, %v2887_v20 }
 0x15a   :  { %2932 = vtanh.f32 %v599_v10 }
 0x15b   :  { %v593_v17 = vpop.f32.mrb[8].mxu1  ;;  %2934 = vtanh.f32 %v600_v23 }
 0x15c   :  { %v2125_v18 = vpop.f32.mrb[9].mxu1  ;;  %v613_v31 = vadd.f32 %v3458_v21, %v593_v17 }
 0x164   :  { %v2933_v27 = vpop.eup %2932 }
 0x165   :  { %v603_v28 = vadd.f32 1.0, %v2933_v27  ;;  %v2935_v41 = vpop.eup %2934 }
 0x166   :  { %v604_v43 = vadd.f32 1.0, %v2935_v41 }
 0x167   :  { %v605_v32 = vmul.f32 0.5, %v603_v28 }
 0x168   :  { %v606_v51 = vmul.f32 0.5, %v604_v43 }
 0x169   :  { %v614_v38 = vmul.f32 %v613_v31, %v605_v32 }
 0x16b   :  { %v615_v39 = vadd.f32 %v614_v38, %v341_v36 }
 0x16d   :  { %2936 = vtanh.f32 %v615_v39 }
 0x177   :  { %v2937_v48 = vpop.eup %2936 }
 0x178   :  { %v617_v53 = vsub.f32 %v3382_v30, %v2937_v48 }
 0x17a   :  { %v618_v57 = vmul.f32 %v617_v53, %v606_v51 }
 0x17c   :  { %v619_v58 = vadd.f32 %v2937_v48, %v618_v57 }
 0x17e   :  { %689 = vmatmul.mubr.f32.vlgmr.msra.gmra.mrb[2].mxu0 %v619_v58  ;;  %2159 = vmatmul.mubr.f32.vlgmr.msra.gmra.mrb[10].mxu1 %v619_v58 }
 0x17f   :  { %2529 = vmatpush1.bf16.msra.mxu0 %v3288_v15  ;;  %2560 = vmatpush3.bf16.msra.mxu1 %v3302_v33 }
 0x180   :  { %2531 = vmatprep.subr.bf16.mxu0 %v3291_v16  ;;  %2561 = vmatprep.subr.bf16.mxu1 %v3158_v40 }
 0x181   :  { %850 = vmatprep.mubr.f32.mxu0 %v3157_v0  ;;  %2193 = vmatprep.mubr.msk.f32.mxu1 %vm3159_vm1, %v3157_v0 }
 0x183   :  { %2533 = vmatpush1.bf16.msra.mxu0 %v3296_v24  ;;  %2563 = vmatpush3.bf16.msra.mxu1 %v3315_v44 }
 0x184   :  { %2535 = vmatprep.subr.bf16.mxu0 %v3299_v26  ;;  %2564 = vmatprep.subr.bf16.mxu1 %v3158_v40 }
 0x187   :  { %2537 = vmatpush1.bf16.msra.mxu0 %v3306_v35  ;;  %2566 = vmatpush3.bf16.msra.mxu1 %v3328_v54 }
 0x188   :  { %2539 = vmatprep.subr.bf16.mxu0 %v3309_v37  ;;  %2567 = vmatprep.subr.bf16.mxu1 %v3158_v40 }
 0x18b   :  { %2541 = vmatpush1.bf16.msra.mxu0 %v3319_v46  ;;  %2569 = vmatpush3.bf16.msra.mxu1 %v3341_v1 }
 0x18c   :  { %2543 = vmatprep.subr.bf16.mxu0 %v3322_v49  ;;  %2570 = vmatprep.subr.bf16.mxu1 %v3158_v40 }
 0x18f   :  { %2545 = vmatpush1.bf16.msra.mxu0 %v3332_v56  ;;  %2572 = vmatpush3.bf16.msra.mxu1 %v3354_v11 }
 0x190   :  { %2547 = vmatprep.subr.bf16.mxu0 %v3335_v59  ;;  %2573 = vmatprep.subr.bf16.mxu1 %v3158_v40 }
 0x193   :  { %2549 = vmatpush1.bf16.msra.mxu0 %v3345_v3  ;;  %2575 = vmatpush3.bf16.msra.mxu1 %v3367_v22 }
 0x194   :  { %2551 = vmatprep.subr.bf16.mxu0 %v3348_v6  ;;  %2576 = vmatprep.subr.bf16.mxu1 %v3158_v40 }
 0x197   :  { %2553 = vmatpush1.bf16.msra.mxu0 %v3358_v14  ;;  %2578 = vmatpush3.bf16.msra.mxu1 %v3378_v29 }
 0x198   :  { %2555 = vmatprep.subr.bf16.mxu0 %v3361_v19  ;;  %2579 = vmatprep.subr.bf16.mxu1 %v3158_v40 }
 0x19b   :  { %2557 = vmatpush1.bf16.msra.mxu0 %v3371_v25  ;;  %2581 = vmatpush3.bf16.msra.mxu1 %v3391_v34 }
 0x19c   :  { %2583 = vmatprep.subr.bf16.mxu0 %v3286_v12  ;;  %2614 = vmatprep.subr.bf16.mxu1 %v3158_v40 }
 0x251   :  { %v690_v30 = vpop.f32.mrb[2].mxu0  ;;  %v761_v42 = vpop.f32.mrb[10].mxu1 }
 0x252   :  { %v2888_v47 = vadd.f32 %v690_v30, %v3445_v61  ;;  %v692_v62 = vpop.f32.mrb[3].mxu0  ;;  %v2160_v2 = vpop.f32.mrb[11].mxu1  ;;  %v775_v18 = vadd.f32 %v3458_v21, %v761_v42 }
 0x253   :  { %v2889_v7 = vadd.f32 %v692_v62, %v3452_v13 }
 0x254   :  { %v767_v4 = vmul.f32 0.5, %v2888_v47 }
 0x255   :  { %v768_v8 = vmul.f32 0.5, %v2889_v7 }
 0x256   :  { %2938 = vtanh.f32 %v767_v4 }
 0x257   :  { %2940 = vtanh.f32 %v768_v8 }
 0x260   :  { %v2939_v9 = vpop.eup %2938 }
 0x261   :  { %v771_v10 = vadd.f32 1.0, %v2939_v9  ;;  %v2941_v27 = vpop.eup %2940 }
 0x262   :  { %v772_v28 = vadd.f32 1.0, %v2941_v27 }
 0x263   :  { %v773_v17 = vmul.f32 0.5, %v771_v10 }
 0x264   :  { %v774_v32 = vmul.f32 0.5, %v772_v28 }
 0x265   :  { %v776_v20 = vmul.f32 %v775_v18, %v773_v17 }
 0x267   :  { %v777_v23 = vadd.f32 %v776_v20, %v3435_v45 }
 0x269   :  { %2942 = vtanh.f32 %v777_v23 }
 0x273   :  { %v2943_v31 = vpop.eup %2942 }
 0x274   :  { %v779_v36 = vsub.f32 %v619_v58, %v2943_v31 }
 0x276   :  { %v780_v38 = vmul.f32 %v779_v36, %v774_v32 }
 0x278   :  { %v781_v39 = vadd.f32 %v2943_v31, %v780_v38 }
 0x27a   :  { %851 = vmatmul.mubr.f32.vlgmr.msra.gmra.mrb[4].mxu0 %v781_v39  ;;  %2194 = vmatmul.mubr.f32.vlgmr.msra.gmra.mrb[12].mxu1 %v781_v39 }
 0x27b   :  { %2585 = vmatpush1.bf16.msra.mxu0 %v3288_v15  ;;  %2616 = vmatpush3.bf16.msra.mxu1 %v3302_v33 }
 0x27c   :  { %2587 = vmatprep.subr.bf16.mxu0 %v3291_v16  ;;  %2617 = vmatprep.subr.bf16.mxu1 %v3158_v40 }
 0x27d   :  { %1012 = vmatprep.mubr.f32.mxu0 %v3157_v0  ;;  %2228 = vmatprep.mubr.msk.f32.mxu1 %vm3159_vm1, %v3157_v0 }
 0x27f   :  { %2589 = vmatpush1.bf16.msra.mxu0 %v3296_v24  ;;  %2619 = vmatpush3.bf16.msra.mxu1 %v3315_v44 }
 0x280   :  { %2591 = vmatprep.subr.bf16.mxu0 %v3299_v26  ;;  %2620 = vmatprep.subr.bf16.mxu1 %v3158_v40 }
 0x283   :  { %2593 = vmatpush1.bf16.msra.mxu0 %v3306_v35  ;;  %2622 = vmatpush3.bf16.msra.mxu1 %v3328_v54 }
 0x284   :  { %2595 = vmatprep.subr.bf16.mxu0 %v3309_v37  ;;  %2623 = vmatprep.subr.bf16.mxu1 %v3158_v40 }
 0x287   :  { %2597 = vmatpush1.bf16.msra.mxu0 %v3319_v46  ;;  %2625 = vmatpush3.bf16.msra.mxu1 %v3341_v1 }
 0x288   :  { %2599 = vmatprep.subr.bf16.mxu0 %v3322_v49  ;;  %2626 = vmatprep.subr.bf16.mxu1 %v3158_v40 }
 0x28b   :  { %2601 = vmatpush1.bf16.msra.mxu0 %v3332_v56  ;;  %2628 = vmatpush3.bf16.msra.mxu1 %v3354_v11 }
 0x28c   :  { %2603 = vmatprep.subr.bf16.mxu0 %v3335_v59  ;;  %2629 = vmatprep.subr.bf16.mxu1 %v3158_v40 }
 0x28f   :  { %2605 = vmatpush1.bf16.msra.mxu0 %v3345_v3  ;;  %2631 = vmatpush3.bf16.msra.mxu1 %v3367_v22 }
 0x290   :  { %2607 = vmatprep.subr.bf16.mxu0 %v3348_v6  ;;  %2632 = vmatprep.subr.bf16.mxu1 %v3158_v40 }
 0x293   :  { %2609 = vmatpush1.bf16.msra.mxu0 %v3358_v14  ;;  %2634 = vmatpush3.bf16.msra.mxu1 %v3378_v29 }
 0x294   :  { %2611 = vmatprep.subr.bf16.mxu0 %v3361_v19  ;;  %2635 = vmatprep.subr.bf16.mxu1 %v3158_v40 }
 0x297   :  { %2613 = vmatpush1.bf16.msra.mxu0 %v3371_v25  ;;  %2637 = vmatpush3.bf16.msra.mxu1 %v3391_v34 }
 0x298   :  { %2639 = vmatprep.subr.bf16.mxu0 %v3286_v12  ;;  %2670 = vmatprep.subr.bf16.mxu1 %v3158_v40 }
 0x34d   :  { %v852_v45 = vpop.f32.mrb[4].mxu0  ;;  %v923_v41 = vpop.f32.mrb[12].mxu1 }
 0x34e   :  { %v2890_v43 = vadd.f32 %v852_v45, %v3445_v61  ;;  %v854_v48 = vpop.f32.mrb[5].mxu0  ;;  %v2195_v51 = vpop.f32.mrb[13].mxu1  ;;  %v937_v62 = vadd.f32 %v3458_v21, %v923_v41 }
 0x34f   :  { %v2891_v57 = vadd.f32 %v854_v48, %v3452_v13 }
 0x350   :  { %v929_v53 = vmul.f32 0.5, %v2890_v43 }
 0x351   :  { %v930_v58 = vmul.f32 0.5, %v2891_v57 }
 0x352   :  { %2944 = vtanh.f32 %v929_v53 }
 0x353   :  { %2946 = vtanh.f32 %v930_v58 }
 0x35c   :  { %v2945_v30 = vpop.eup %2944 }
 0x35d   :  { %v933_v42 = vadd.f32 1.0, %v2945_v30  ;;  %v2947_v7 = vpop.eup %2946 }
 0x35e   :  { %v934_v8 = vadd.f32 1.0, %v2947_v7 }
 0x35f   :  { %v935_v47 = vmul.f32 0.5, %v933_v42 }
 0x360   :  { %v936_v10 = vmul.f32 0.5, %v934_v8 }
 0x361   :  { %v938_v2 = vmul.f32 %v937_v62, %v935_v47 }
 0x363   :  { %v939_v4 = vadd.f32 %v938_v2, %v3439_v52 }
 0x365   :  { %2948 = vtanh.f32 %v939_v4 }
 0x36f   :  { %v2949_v9 = vpop.eup %2948 }
 0x370   :  { %v941_v17 = vsub.f32 %v781_v39, %v2949_v9 }
 0x372   :  { %v942_v18 = vmul.f32 %v941_v17, %v936_v10 }
 0x374   :  { %v943_v20 = vadd.f32 %v2949_v9, %v942_v18 }
 0x376   :  { %1013 = vmatmul.mubr.f32.vlgmr.msra.gmra.mrb[6].mxu0 %v943_v20  ;;  %2229 = vmatmul.mubr.f32.vlgmr.msra.gmra.mrb[14].mxu1 %v943_v20 }
 0x377   :  { %2641 = vmatpush1.bf16.msra.mxu0 %v3288_v15  ;;  %2672 = vmatpush3.bf16.msra.mxu1 %v3302_v33 }
 0x378   :  { %2643 = vmatprep.subr.bf16.mxu0 %v3291_v16  ;;  %2673 = vmatprep.subr.bf16.mxu1 %v3158_v40 }
 0x379   :  { %1174 = vmatprep.mubr.f32.mxu0 %v3157_v0  ;;  %2263 = vmatprep.mubr.msk.f32.mxu1 %vm3159_vm1, %v3157_v0 }
 0x37b   :  { %2645 = vmatpush1.bf16.msra.mxu0 %v3296_v24  ;;  %2675 = vmatpush3.bf16.msra.mxu1 %v3315_v44 }
 0x37c   :  { %2647 = vmatprep.subr.bf16.mxu0 %v3299_v26  ;;  %2676 = vmatprep.subr.bf16.mxu1 %v3158_v40 }
 0x37f   :  { %2649 = vmatpush1.bf16.msra.mxu0 %v3306_v35  ;;  %2678 = vmatpush3.bf16.msra.mxu1 %v3328_v54 }
 0x380   :  { %2651 = vmatprep.subr.bf16.mxu0 %v3309_v37  ;;  %2679 = vmatprep.subr.bf16.mxu1 %v3158_v40 }
 0x383   :  { %2653 = vmatpush1.bf16.msra.mxu0 %v3319_v46  ;;  %2681 = vmatpush3.bf16.msra.mxu1 %v3341_v1 }
 0x384   :  { %2655 = vmatprep.subr.bf16.mxu0 %v3322_v49  ;;  %2682 = vmatprep.subr.bf16.mxu1 %v3158_v40 }
 0x387   :  { %2657 = vmatpush1.bf16.msra.mxu0 %v3332_v56  ;;  %2684 = vmatpush3.bf16.msra.mxu1 %v3354_v11 }
 0x388   :  { %2659 = vmatprep.subr.bf16.mxu0 %v3335_v59  ;;  %2685 = vmatprep.subr.bf16.mxu1 %v3158_v40 }
 0x38b   :  { %2661 = vmatpush1.bf16.msra.mxu0 %v3345_v3  ;;  %2687 = vmatpush3.bf16.msra.mxu1 %v3367_v22 }
 0x38c   :  { %2663 = vmatprep.subr.bf16.mxu0 %v3348_v6  ;;  %2688 = vmatprep.subr.bf16.mxu1 %v3158_v40 }
 0x38f   :  { %2665 = vmatpush1.bf16.msra.mxu0 %v3358_v14  ;;  %2690 = vmatpush3.bf16.msra.mxu1 %v3378_v29 }
 0x390   :  { %2667 = vmatprep.subr.bf16.mxu0 %v3361_v19  ;;  %2691 = vmatprep.subr.bf16.mxu1 %v3158_v40 }
 0x393   :  { %2669 = vmatpush1.bf16.msra.mxu0 %v3371_v25  ;;  %2693 = vmatpush3.bf16.msra.mxu1 %v3391_v34 }
 0x394   :  { %2695 = vmatprep.subr.bf16.mxu0 %v3286_v12  ;;  %2726 = vmatprep.subr.bf16.mxu1 %v3158_v40 }
 0x449   :  { %v1014_v52 = vpop.f32.mrb[6].mxu0  ;;  %v1085_v23 = vpop.f32.mrb[14].mxu1 }
 0x44a   :  { %v2892_v27 = vadd.f32 %v1014_v52, %v3445_v61  ;;  %v1016_v28 = vpop.f32.mrb[7].mxu0  ;;  %v2230_v31 = vpop.f32.mrb[15].mxu1  ;;  %v1099_v43 = vadd.f32 %v3458_v21, %v1085_v23 }
 0x44b   :  { %v2893_v36 = vadd.f32 %v1016_v28, %v3452_v13 }
 0x44c   :  { %v1091_v32 = vmul.f32 0.5, %v2892_v27 }
 0x44d   :  { %v1092_v38 = vmul.f32 0.5, %v2893_v36 }
 0x44e   :  { %2950 = vtanh.f32 %v1091_v32 }
 0x44f   :  { %2952 = vtanh.f32 %v1092_v38 }
 0x458   :  { %v2951_v39 = vpop.eup %2950 }
 0x459   :  { %v1095_v45 = vadd.f32 1.0, %v2951_v39  ;;  %v2953_v53 = vpop.eup %2952 }
 0x45a   :  { %v1096_v57 = vadd.f32 1.0, %v2953_v53 }
 0x45b   :  { %v1097_v41 = vmul.f32 0.5, %v1095_v45 }
 0x45c   :  { %v1098_v30 = vmul.f32 0.5, %v1096_v57 }
 0x45d   :  { %v1100_v48 = vmul.f32 %v1099_v43, %v1097_v41 }
 0x45f   :  { %v1101_v51 = vadd.f32 %v1100_v48, %v3437_v50 }
 0x461   :  { %2954 = vtanh.f32 %v1101_v51 }
 0x46b   :  { %v2955_v58 = vpop.eup %2954 }
 0x46c   :  { %v1103_v42 = vsub.f32 %v943_v20, %v2955_v58 }
 0x46e   :  { %v1104_v47 = vmul.f32 %v1103_v42, %v1098_v30 }
 0x470   :  { %v1105_v62 = vadd.f32 %v2955_v58, %v1104_v47 }
 0x472   :  { %1175 = vmatmul.mubr.f32.vlgmr.msra.gmra.mrb[8].mxu0 %v1105_v62  ;;  %2264 = vmatmul.mubr.f32.vlgmr.msra.gmra.mrb[16].mxu1 %v1105_v62 }
 0x473   :  { %2697 = vmatpush1.bf16.msra.mxu0 %v3288_v15  ;;  %2728 = vmatpush3.bf16.msra.mxu1 %v3302_v33 }
 0x474   :  { %2699 = vmatprep.subr.bf16.mxu0 %v3291_v16  ;;  %2729 = vmatprep.subr.bf16.mxu1 %v3158_v40 }
 0x475   :  { %1336 = vmatprep.mubr.f32.mxu0 %v3157_v0  ;;  %2298 = vmatprep.mubr.msk.f32.mxu1 %vm3159_vm1, %v3157_v0 }
 0x477   :  { %2701 = vmatpush1.bf16.msra.mxu0 %v3296_v24  ;;  %2731 = vmatpush3.bf16.msra.mxu1 %v3315_v44 }
 0x478   :  { %2703 = vmatprep.subr.bf16.mxu0 %v3299_v26  ;;  %2732 = vmatprep.subr.bf16.mxu1 %v3158_v40 }
 0x47b   :  { %2705 = vmatpush1.bf16.msra.mxu0 %v3306_v35  ;;  %2734 = vmatpush3.bf16.msra.mxu1 %v3328_v54 }
 0x47c   :  { %2707 = vmatprep.subr.bf16.mxu0 %v3309_v37  ;;  %2735 = vmatprep.subr.bf16.mxu1 %v3158_v40 }
 0x47f   :  { %2709 = vmatpush1.bf16.msra.mxu0 %v3319_v46  ;;  %2737 = vmatpush3.bf16.msra.mxu1 %v3341_v1 }
 0x480   :  { %2711 = vmatprep.subr.bf16.mxu0 %v3322_v49  ;;  %2738 = vmatprep.subr.bf16.mxu1 %v3158_v40 }
 0x483   :  { %2713 = vmatpush1.bf16.msra.mxu0 %v3332_v56  ;;  %2740 = vmatpush3.bf16.msra.mxu1 %v3354_v11 }
 0x484   :  { %2715 = vmatprep.subr.bf16.mxu0 %v3335_v59  ;;  %2741 = vmatprep.subr.bf16.mxu1 %v3158_v40 }
 0x487   :  { %2717 = vmatpush1.bf16.msra.mxu0 %v3345_v3  ;;  %2743 = vmatpush3.bf16.msra.mxu1 %v3367_v22 }
 0x488   :  { %2719 = vmatprep.subr.bf16.mxu0 %v3348_v6  ;;  %2744 = vmatprep.subr.bf16.mxu1 %v3158_v40 }
 0x48b   :  { %2721 = vmatpush1.bf16.msra.mxu0 %v3358_v14  ;;  %2746 = vmatpush3.bf16.msra.mxu1 %v3378_v29 }
 0x48c   :  { %2723 = vmatprep.subr.bf16.mxu0 %v3361_v19  ;;  %2747 = vmatprep.subr.bf16.mxu1 %v3158_v40 }
 0x48f   :  { %2725 = vmatpush1.bf16.msra.mxu0 %v3371_v25  ;;  %2749 = vmatpush3.bf16.msra.mxu1 %v3391_v34 }
 0x490   :  { %2751 = vmatprep.subr.bf16.mxu0 %v3286_v12  ;;  %2782 = vmatprep.subr.bf16.mxu1 %v3158_v40 }
 0x545   :  { %v1176_v50 = vpop.f32.mrb[8].mxu0  ;;  %v1247_v2 = vpop.f32.mrb[16].mxu1 }
 0x546   :  { %v2894_v4 = vadd.f32 %v1176_v50, %v3445_v61  ;;  %v1178_v7 = vpop.f32.mrb[9].mxu0  ;;  %v2265_v8 = vpop.f32.mrb[17].mxu1  ;;  %v1261_v23 = vadd.f32 %v3458_v21, %v1247_v2 }
 0x547   :  { %v2895_v10 = vadd.f32 %v1178_v7, %v3452_v13 }
 0x548   :  { %v1253_v9 = vmul.f32 0.5, %v2894_v4 }
 0x549   :  { %v1254_v17 = vmul.f32 0.5, %v2895_v10 }
 0x54a   :  { %2956 = vtanh.f32 %v1253_v9 }
 0x54b   :  { %2958 = vtanh.f32 %v1254_v17 }
 0x554   :  { %v2957_v18 = vpop.eup %2956 }
 0x555   :  { %v1257_v20 = vadd.f32 1.0, %v2957_v18  ;;  %v2959_v31 = vpop.eup %2958 }
 0x556   :  { %v1258_v32 = vadd.f32 1.0, %v2959_v31  ;;  %v1764_v31 = vld [vmem:[#allocation11 + $0x30] sm:$0xff] }
 0x557   :  { %v1259_v52 = vmul.f32 0.5, %v1257_v20  ;;  %v1761_v20 = vld [vmem:[#allocation11 + $0x18] sm:$0xff] }
 0x558   :  { %v1260_v38 = vmul.f32 0.5, %v1258_v32 }
 0x559   :  { %v1262_v27 = vmul.f32 %v1261_v23, %v1259_v52  ;;  %v1762_v23 = vld [vmem:[#allocation11 + $0x20] sm:$0xff] }
 0x55b   :  { %v1263_v28 = vadd.f32 %v1262_v27, %v3443_v60  ;;  %v1763_v27 = vld [vmem:[#allocation11 + $0x28] sm:$0xff] }
 0x55d   :  { %2960 = vtanh.f32 %v1263_v28  ;;  %v2869_v28 = vpack.c.bf16 %v1763_v27, %v1762_v23 }
 0x567   :  { %v2961_v36 = vpop.eup %2960 }
 0x568   :  { %v1265_v39 = vsub.f32 %v1105_v62, %v2961_v36 }
 0x56a   :  { %v1266_v45 = vmul.f32 %v1265_v39, %v1260_v38  ;;  %v1767_v38 = vld [vmem:[#allocation11 + $0x48] sm:$0xff] }
 0x56c   :  { %v1267_v41 = vadd.f32 %v2961_v36, %v1266_v45  ;;  %v1766_v36 = vld [vmem:[#allocation11 + $0x40] sm:$0xff]  ;;  %v1768_v45 = vld [vmem:[#allocation11 + $0x50] sm:$0xff] }
 0x56d   :  { %v2875_v39 = vpack.c.bf16 %v1767_v38, %v1766_v36 }
 0x56e   :  { %1337 = vmatmul.mubr.f32.vlgmr.msra.gmra.mrb[10].mxu0 %v1267_v41  ;;  %2299 = vmatmul.mubr.f32.vlgmr.msra.gmra.mrb[18].mxu1 %v1267_v41 }
 0x56f   :  { %2753 = vmatpush1.bf16.msra.mxu0 %v3288_v15  ;;  %2784 = vmatpush3.bf16.msra.mxu1 %v3302_v33 }
 0x570   :  { %2755 = vmatprep.subr.bf16.mxu0 %v3291_v16  ;;  %2785 = vmatprep.subr.bf16.mxu1 %v3158_v40 }
 0x571   :  { %1498 = vmatprep.mubr.f32.mxu0 %v3157_v0  ;;  %2333 = vmatprep.mubr.msk.f32.mxu1 %vm3159_vm1, %v3157_v0 }
 0x573   :  { %2757 = vmatpush1.bf16.msra.mxu0 %v3296_v24  ;;  %2787 = vmatpush3.bf16.msra.mxu1 %v3315_v44 }
 0x574   :  { %2759 = vmatprep.subr.bf16.mxu0 %v3299_v26  ;;  %2788 = vmatprep.subr.bf16.mxu1 %v3158_v40 }
 0x577   :  { %2761 = vmatpush1.bf16.msra.mxu0 %v3306_v35  ;;  %2790 = vmatpush3.bf16.msra.mxu1 %v3328_v54 }
 0x578   :  { %2763 = vmatprep.subr.bf16.mxu0 %v3309_v37  ;;  %2791 = vmatprep.subr.bf16.mxu1 %v3158_v40 }
 0x57b   :  { %2765 = vmatpush1.bf16.msra.mxu0 %v3319_v46  ;;  %2793 = vmatpush3.bf16.msra.mxu1 %v3341_v1 }
 0x57c   :  { %2767 = vmatprep.subr.bf16.mxu0 %v3322_v49  ;;  %2794 = vmatprep.subr.bf16.mxu1 %v3158_v40 }
 0x57f   :  { %2769 = vmatpush1.bf16.msra.mxu0 %v3332_v56  ;;  %2796 = vmatpush3.bf16.msra.mxu1 %v3354_v11 }
 0x580   :  { %2771 = vmatprep.subr.bf16.mxu0 %v3335_v59  ;;  %2797 = vmatprep.subr.bf16.mxu1 %v3158_v40 }
 0x583   :  { %2773 = vmatpush1.bf16.msra.mxu0 %v3345_v3  ;;  %2799 = vmatpush3.bf16.msra.mxu1 %v3367_v22 }
 0x584   :  { %2775 = vmatprep.subr.bf16.mxu0 %v3348_v6  ;;  %2800 = vmatprep.subr.bf16.mxu1 %v3158_v40 }
 0x587   :  { %2777 = vmatpush1.bf16.msra.mxu0 %v3358_v14  ;;  %2802 = vmatpush3.bf16.msra.mxu1 %v3378_v29 }
 0x588   :  { %2779 = vmatprep.subr.bf16.mxu0 %v3361_v19  ;;  %2803 = vmatprep.subr.bf16.mxu1 %v3158_v40 }
 0x58b   :  { %2781 = vmatpush1.bf16.msra.mxu0 %v3371_v25  ;;  %2805 = vmatpush3.bf16.msra.mxu1 %v3391_v34 }
 0x58c   :  { %2807 = vmatprep.subr.bf16.mxu0 %v3286_v12  ;;  %2838 = vmatprep.subr.bf16.mxu1 %v3158_v40 }
 0x641   :  { %v1338_v60 = vpop.f32.mrb[10].mxu0  ;;  %v1409_v43 = vpop.f32.mrb[18].mxu1 }
 0x642   :  { %v2896_v48 = vadd.f32 %v1338_v60, %v3445_v61  ;;  %v1340_v51 = vpop.f32.mrb[11].mxu0  ;;  %v2300_v53 = vpop.f32.mrb[19].mxu1  ;;  %v1423_v50 = vadd.f32 %v3458_v21, %v1409_v43  ;;  %v1770_v43 = vld [vmem:[#allocation11 + $0x60] sm:$0xff] }
 0x643   :  { %v2897_v58 = vadd.f32 %v1340_v51, %v3452_v13  ;;  %v1772_v53 = vld [vmem:[#allocation11 + $0x70] sm:$0xff] }
 0x644   :  { %v1415_v57 = vmul.f32 0.5, %v2896_v48  ;;  %v1771_v48 = vld [vmem:[#allocation11 + $0x68] sm:$0xff] }
 0x645   :  { %v1416_v30 = vmul.f32 0.5, %v2897_v58  ;;  %v2881_v51 = vpack.c.bf16 %v1771_v48, %v1770_v43 }
 0x646   :  { %2962 = vtanh.f32 %v1415_v57  ;;  %v1773_v57 = vld [vmem:[#allocation11 + $0x78] sm:$0xff] }
 0x647   :  { %2964 = vtanh.f32 %v1416_v30  ;;  %v2884_v58 = vpack.c.bf16 %v1773_v57, %v1772_v53 }
 0x650   :  { %v2963_v42 = vpop.eup %2962 }
 0x651   :  { %v1419_v47 = vadd.f32 1.0, %v2963_v42  ;;  %v2965_v4 = vpop.eup %2964 }
 0x652   :  { %v1420_v7 = vadd.f32 1.0, %v2965_v4 }
 0x653   :  { %v1421_v62 = vmul.f32 0.5, %v1419_v47 }
 0x654   :  { %v1422_v9 = vmul.f32 0.5, %v1420_v7 }
 0x655   :  { %v1424_v12 = vmul.f32 %v1423_v50, %v1421_v62 }
 0x657   :  { %v1425_v2 = vadd.f32 %v1424_v12, %v3441_v55 }
 0x659   :  { %2966 = vtanh.f32 %v1425_v2 }
 0x663   :  { %v2967_v8 = vpop.eup %2966 }
 0x664   :  { %v1427_v10 = vsub.f32 %v1267_v41, %v2967_v8  ;;  %v1769_v41 = vld [vmem:[#allocation11 + $0x58] sm:$0xff] }
 0x665   :  { %v2878_v60 = vpack.c.bf16 %v1769_v41, %v1768_v45 }
 0x666   :  { %v1428_v17 = vmul.f32 %v1427_v10, %v1422_v9 }
 0x668   :  { %v1429_v18 = vadd.f32 %v2967_v8, %v1428_v17 }
 0x66a   :  { %1499 = vmatmul.mubr.f32.vlgmr.msra.gmra.mrb[12].mxu0 %v1429_v18  ;;  %2334 = vmatmul.mubr.f32.vlgmr.msra.gmra.mrb[20].mxu1 %v1429_v18 }
 0x66b   :  { %2809 = vmatpush1.bf16.msra.mxu0 %v3288_v15  ;;  %2840 = vmatpush3.bf16.msra.mxu1 %v3302_v33 }
 0x66c   :  { %2811 = vmatprep.subr.bf16.mxu0 %v3291_v16  ;;  %2841 = vmatprep.subr.bf16.mxu1 %v3158_v40 }
 0x66d   :  { %1660 = vmatprep.mubr.f32.mxu0 %v3157_v0  ;;  %2368 = vmatprep.mubr.msk.f32.mxu1 %vm3159_vm1, %v3157_v0 }
 0x66f   :  { %2813 = vmatpush1.bf16.msra.mxu0 %v3296_v24  ;;  %2843 = vmatpush3.bf16.msra.mxu1 %v3315_v44 }
 0x670   :  { %2815 = vmatprep.subr.bf16.mxu0 %v3299_v26  ;;  %2844 = vmatprep.subr.bf16.mxu1 %v3158_v40 }
 0x673   :  { %2817 = vmatpush1.bf16.msra.mxu0 %v3306_v35  ;;  %2846 = vmatpush3.bf16.msra.mxu1 %v3328_v54 }
 0x674   :  { %2819 = vmatprep.subr.bf16.mxu0 %v3309_v37  ;;  %2847 = vmatprep.subr.bf16.mxu1 %v3158_v40 }
 0x677   :  { %2821 = vmatpush1.bf16.msra.mxu0 %v3319_v46  ;;  %2849 = vmatpush3.bf16.msra.mxu1 %v3341_v1 }
 0x678   :  { %2823 = vmatprep.subr.bf16.mxu0 %v3322_v49  ;;  %2850 = vmatprep.subr.bf16.mxu1 %v3158_v40 }
 0x67b   :  { %2825 = vmatpush1.bf16.msra.mxu0 %v3332_v56  ;;  %2852 = vmatpush3.bf16.msra.mxu1 %v3354_v11 }
 0x67c   :  { %2827 = vmatprep.subr.bf16.mxu0 %v3335_v59  ;;  %2853 = vmatprep.subr.bf16.mxu1 %v3158_v40 }
 0x67f   :  { %2829 = vmatpush1.bf16.msra.mxu0 %v3345_v3  ;;  %2855 = vmatpush3.bf16.msra.mxu1 %v3367_v22 }
 0x680   :  { %2831 = vmatprep.subr.bf16.mxu0 %v3348_v6  ;;  %2856 = vmatprep.subr.bf16.mxu1 %v3158_v40 }
 0x683   :  { %2833 = vmatpush1.bf16.msra.mxu0 %v3358_v14  ;;  %2858 = vmatpush3.bf16.msra.mxu1 %v3378_v29  ;;  %v1758_v29 = vld [vmem:[#allocation11] sm:$0xff] }
 0x684   :  { %2835 = vmatprep.subr.bf16.mxu0 %v3361_v19  ;;  %2859 = vmatprep.subr.bf16.mxu1 %v3158_v40 }
 0x687   :  { %2837 = vmatpush1.bf16.msra.mxu0 %v3371_v25  ;;  %2861 = vmatpush3.bf16.msra.mxu1 %v3391_v34  ;;  %v1759_v34 = vld [vmem:[#allocation11 + $0x8] sm:$0xff] }
 0x688   :  { %2862 = vmatprep.subr.bf16.mxu0 %v3158_v40  ;;  %v2863_v55 = vpack.c.bf16 %v1759_v34, %v1758_v29 }
 0x73d   :  { %v1500_v15 = vpop.f32.mrb[12].mxu0  ;;  %v1571_v16 = vpop.f32.mrb[20].mxu1 }
 0x73e   :  { %v2898_v24 = vadd.f32 %v1500_v15, %v3445_v61  ;;  %v1502_v26 = vpop.f32.mrb[13].mxu0  ;;  %v2335_v33 = vpop.f32.mrb[21].mxu1  ;;  %v1585_v56 = vadd.f32 %v3458_v21, %v1571_v16 }
 0x73f   :  { %v2899_v37 = vadd.f32 %v1502_v26, %v3452_v13 }
 0x740   :  { %v1577_v35 = vmul.f32 0.5, %v2898_v24 }
 0x741   :  { %v1578_v44 = vmul.f32 0.5, %v2899_v37 }
 0x742   :  { %2968 = vtanh.f32 %v1577_v35 }
 0x743   :  { %2970 = vtanh.f32 %v1578_v44 }
 0x74c   :  { %v2969_v46 = vpop.eup %2968 }
 0x74d   :  { %v1581_v49 = vadd.f32 1.0, %v2969_v46  ;;  %v2971_v3 = vpop.eup %2970 }
 0x74e   :  { %v1582_v6 = vadd.f32 1.0, %v2971_v3 }
 0x74f   :  { %v1583_v54 = vmul.f32 0.5, %v1581_v49 }
 0x750   :  { %v1584_v14 = vmul.f32 0.5, %v1582_v6 }
 0x751   :  { %v1586_v59 = vmul.f32 %v1585_v56, %v1583_v54 }
 0x753   :  { %v1587_v1 = vadd.f32 %v1586_v59, %v3449_v5  ;;  %v1760_v5 = vld [vmem:[#allocation11 + $0x10] sm:$0xff] }
 0x754   :  { %v2866_v52 = vpack.c.bf16 %v1761_v20, %v1760_v5 }
 0x755   :  { %2972 = vtanh.f32 %v1587_v1 }
 0x75f   :  { %v2973_v11 = vpop.eup %2972 }
 0x760   :  { %v1589_v19 = vsub.f32 %v1429_v18, %v2973_v11 }
 0x762   :  { %v1590_v22 = vmul.f32 %v1589_v19, %v1584_v14 }
 0x764   :  { %v3695_v25 = vadd.f32 %v2973_v11, %v1590_v22 }
 0x766   :  { %1661 = vmatmul.mubr.f32.vlgmr.msra.gmra.mrb[14].mxu0 %v3695_v25  ;;  %2369 = vmatmul.mubr.f32.vlgmr.msra.gmra.mrb[22].mxu1 %v3695_v25 }
 0x767   :  { %2403 = vmatprep.mubr.msk.f32.mxu0 %vm3159_vm1, %v3157_v0  ;;  %2864 = vmatpush3.bf16.msra.mxu0 %v2863_v55  ;;  %v1765_v0 = vld [vmem:[#allocation11 + $0x38] sm:$0xff] }
 0x768   :  { %2865 = vmatprep.subr.bf16.mxu0 %v3158_v40  ;;  %v2872_v32 = vpack.c.bf16 %v1765_v0, %v1764_v31 }
 0x76b   :  { %2867 = vmatpush3.bf16.msra.mxu0 %v2866_v52 }
 0x76c   :  { %2868 = vmatprep.subr.bf16.mxu0 %v3158_v40 }
 0x76f   :  { %2870 = vmatpush3.bf16.msra.mxu0 %v2869_v28 }
 0x770   :  { %2871 = vmatprep.subr.bf16.mxu0 %v3158_v40 }
 0x773   :  { %2873 = vmatpush3.bf16.msra.mxu0 %v2872_v32 }
 0x774   :  { %2874 = vmatprep.subr.bf16.mxu0 %v3158_v40 }
 0x777   :  { %2876 = vmatpush3.bf16.msra.mxu0 %v2875_v39 }
 0x778   :  { %2877 = vmatprep.subr.bf16.mxu0 %v3158_v40 }
 0x77b   :  { %2879 = vmatpush3.bf16.msra.mxu0 %v2878_v60 }
 0x77c   :  { %2880 = vmatprep.subr.bf16.mxu0 %v3158_v40 }
 0x77f   :  { %2882 = vmatpush3.bf16.msra.mxu0 %v2881_v51 }
 0x780   :  { %2883 = vmatprep.subr.bf16.mxu0 %v3158_v40 }
 0x783   :  { %2885 = vmatpush3.bf16.msra.mxu0 %v2884_v58 }
 0x839   :  { %v1662_v30 = vpop.f32.mrb[14].mxu0  ;;  %v1733_v42 = vpop.f32.mrb[22].mxu1 }
 0x83a   :  { %v2900_v47 = vadd.f32 %v1662_v30, %v3445_v61  ;;  %v1664_v62 = vpop.f32.mrb[15].mxu0  ;;  %v2370_v50 = vpop.f32.mrb[23].mxu1  ;;  %v1747_v40 = vadd.f32 %v3458_v21, %v1733_v42 }
 0x83b   :  { %v2901_v2 = vadd.f32 %v1664_v62, %v3452_v13  ;;  %v1911_v13 = vld [vmem:[%s3747_s7] ss:$0 sm:$0xff] }
 0x83c   :  { %v1739_v12 = vmul.f32 0.5, %v2900_v47 }
 0x83d   :  { %v1740_v4 = vmul.f32 0.5, %v2901_v2 }
 0x83e   :  { %2974 = vtanh.f32 %v1739_v12 }
 0x83f   :  { %2976 = vtanh.f32 %v1740_v4 }
 0x848   :  { %v2975_v7 = vpop.eup %2974 }
 0x849   :  { %v1743_v8 = vadd.f32 1.0, %v2975_v7  ;;  %v2977_v18 = vpop.eup %2976 }
 0x84a   :  { %v1744_v15 = vadd.f32 1.0, %v2977_v18 }
 0x84b   :  { %v1745_v9 = vmul.f32 0.5, %v1743_v8 }
 0x84c   :  { %v1746_v16 = vmul.f32 0.5, %v1744_v15 }
 0x84d   :  { %v1748_v10 = vmul.f32 %v1747_v40, %v1745_v9 }
 0x84f   :  { %v1749_v17 = vadd.f32 %v1748_v10, %v3447_v63 }
 0x851   :  { %2978 = vtanh.f32 %v1749_v17 }
 0x85b   :  { %v2979_v61 = vpop.eup %2978 }
 0x85c   :  { %v1751_v24 = vsub.f32 %v3695_v25, %v2979_v61 }
 0x85e   :  { %v1752_v26 = vmul.f32 %v1751_v24, %v1746_v16 }
 0x860   :  { %v1753_v33 = vadd.f32 %v2979_v61, %v1752_v26 }
 0x862   :  { %2404 = vmatmul.mubr.f32.vlgmr.msra.gmra.mrb[16].mxu0 %v1753_v33  ;;  %1754 = vst [vmem:[#allocation13] sm:$0xff] %v1753_v33 }
 0x935   :  { %v1847_v21 = vpop.f32.mrb[16].mxu0 }
 0x936   :  { %v1848_v35 = vadd.f32 %v1911_v13, %v1847_v21  ;;  %v2405_v37 = vpop.f32.mrb[17].mxu0 }
 0x938   :  { %1851 = vmax.xlane.f32.xlu0 %v1848_v35 }
 0x9c5   :  { %v1852_v63 = vpop.xlane.xlu0 %1851 }
 0x9c6   :  { %v1853_v44 = vsub.f32 %v1848_v35, %v1852_v63 }
 0x9c8   :  { %v1854_v46 = vmul.f32 1.442695, %v1853_v44 }
 0x9ca   :  { %2980 = vpow2.f32 %v1854_v46 }
 0x9d4   :  { %v2981_v49 = vpop.eup %2980 }
 0x9d5   :  { %1856 = vadd.xlane.f32.xlu0 %v2981_v49 }
 0x9d6   :  { %3105 = shalt.err (!%p3102_p2)
}
 0x9d7   :  { %s3106_s13 = scalar_lea.hbm %s3749_s9, 128 }
 0x9d8   :  { %p3107_p3 = scmp.ne.s32.totalorder %s3749_s9, %s3106_s13  ;;  %p3110_p4 = scmp.lt.u32.totalorder %s3106_s13, %s3749_s9 }
 0x9da   :  { %p3112_p5 = pnand %p3110_p4, %p3107_p3 }
 0x9dc   :  { %3115 = shalt.err (!%p3112_p5)
}
 0x9dd   :  { %1882 = dma.vmem_to_hbm [thread:$0]  %s1880_s30, 128, %s3749_s9, [#allocation14]  }
 0x9de   :  { %s3161_s18 = smov [#allocation12]  }
 0x9df   :  { %s1869_s19 = sshll.u32 %s3161_s18, 4  ;;  %s1870_s19 = int_to_ptr.vmem [resolvable:$true] %s1869_s19 }
 0x9e0   :  { %s3116_s20 = scalar_lea.vmem %s1870_s19, 128  ;;  %p3121_p7 = scmp.lt.s32.totalorder %s1870_s19, %s1870_s19 }
 0x9e1   :  { %p3117_p6 = scmp.ne.s32.totalorder %s1870_s19, %s3116_s20  ;;  %p3122_p8 = scmp.lt.s32.totalorder %s3116_s20, %s3116_s20 }
 0x9e3   :  { %p3123_p9 = por %p3122_p8, %p3121_p7 }
 0x9e5   :  { %p3124_p10 = pnand %p3123_p9, %p3117_p6 }
 0xa62   :  { %v1857_v54 = vpop.xlane.xlu0 %1856 }
 0xa63   :  { %2982 = vlog2.f32 %v1857_v54 }
 0xa6d   :  { %v2983_v56 = vpop.eup %2982 }
 0xa6e   :  { %v1859_v59 = vmul.f32 0.6931472, %v2983_v56 }
 0xa70   :  { %v1860_v1 = vadd.f32 %v1859_v59, %v1852_v63 }
 0xa72   :  { %v1861_v3 = vsub.f32 %v1848_v35, %v1860_v1 }
 0xa74   :  { %1862 = vst [vmem:[#allocation12] sm:$0xff] %v1861_v3 }
 0xa75   :  { %3127 = shalt.err (!%p3124_p10)
}
 0xa76   :  { %s3128_s9 = scalar_lea.hbm %s3748_s8, 128 }
 0xa77   :  { %p3129_p11 = scmp.ne.s32.totalorder %s3748_s8, %s3128_s9  ;;  %p3132_p12 = scmp.lt.u32.totalorder %s3128_s9, %s3748_s8 }
 0xa79   :  { %p3134_p13 = pnand %p3132_p12, %p3129_p11 }
 0xa7b   :  { %3137 = shalt.err (!%p3134_p13)
}
 0xa7c   :  { %1872 = dma.vmem_to_hbm [thread:$0]  %s1870_s19, 128, %s3748_s8, [#allocation5]  }
 0xa7d   :  { %3144 = dma.done.wait [#allocation5], 128  }
 0xa7e   :  { %3145 = vsyncadd [#allocation5], 4294967168 }
 0xa7f   :  { %3146 = dma.done.wait [#allocation14], 128  }
 0xa80   :  { %3147 = vsyncadd [#allocation14], 4294967168 }
 0xa81   :  { %1889 = vsyncpa [#allocation4], 1 }
 0xa82   :  { %1890 = vsyncpa [#allocation7], 1 }
 0xa83   :  { %1891 = vsyncpa [#allocation10], 1 }
 0xa84   :  { %1892 = vsyncpa [#allocation5], 1 }
 0xa85   :  { %1893 = vsyncpa [#allocation14], 1 }

</bundles_post_ra>
